<compile_context>
chip_gen: v7x
topology: tpu7x:2x2x1
jax: 0.10.0
libtpu: 0.0.40
codegen_flags: <defaults>
</compile_context>

<pallas_src>
import functools

import jax
import jax.numpy as jnp
from jax.experimental import pallas as pl
from jax.experimental.pallas import tpu as pltpu


# ----------------------------------------------------------------------------
# Fused decoder kernel (one grid step = one batch chunk, whole network depth)
# ----------------------------------------------------------------------------
def _fused_decoder_kernel(
    emb_ref,        # [B*T, E]   token+pos embedding (flattened)
    encc_t_ref,     # [B, E, S]  encoder_conved, pre-transposed
    encm_ref,       # [B, S, E]  encoder_combined
    w_e2h_ref,      # [E, H]     emb2hid
    b_e2h_ref,      # [1, H]
    conv_wa_ref,    # [L, K*H, H]  GLU "value" half (im2col layout)
    conv_wb_ref,    # [L, K*H, H]  GLU "gate" half
    conv_ba_ref,    # [L, 1, H]
    conv_bb_ref,    # [L, 1, H]
    w_h2e_ref,      # [H, E]     attn_hid2emb
    b_h2e_ref,      # [1, E]
    w_ae2h_ref,     # [E, H]     attn_emb2hid
    b_ae2h_ref,     # [1, H]
    w_h2emb_ref,    # [H, E]     hid2emb
    b_h2emb_ref,    # [1, E]
    w_fc_ref,       # [E, Vp]    fc_out (vocab padded to lane multiple)
    b_fc_ref,       # [1, Vp]
    out_ref,        # [B*T, Vp]
    attn_ref,       # [B, T, S]  (last layer only)
    *, B, T, K, H, E, n_layers, scale, pad_value,
):
    f32 = jnp.float32
    emb = emb_ref[...]                                             # [B*T, E]

    # emb2hid over all B*T rows at once (full MXU M dimension).
    conv_input = (
        jnp.dot(emb, w_e2h_ref[...], preferred_element_type=f32) + b_e2h_ref[...]
    )                                                              # [B*T, H]

    encc_t = encc_t_ref[...]                                       # [B, E, S]
    encm = encm_ref[...]                                           # [B, S, E]
    pad_block = jnp.full((B, K - 1, H), pad_value, f32)            # in-kernel pad

    attn = None
    for l in range(n_layers):                                      # static unroll
        # --- causal conv as ONE im2col matmul (contraction depth K*H) ---
        x3 = conv_input.reshape(B, T, H)
        padded = jnp.concatenate([pad_block, x3], axis=1)          # [B, T+K-1, H]
        im2col = jnp.concatenate(
            [padded[:, k:k + T, :] for k in range(K)], axis=-1
        ).reshape(B * T, K * H)                                    # [B*T, K*H]
        a = (jnp.dot(im2col, conv_wa_ref[l], preferred_element_type=f32)
             + conv_ba_ref[l])                                     # [B*T, H]
        g = (jnp.dot(im2col, conv_wb_ref[l], preferred_element_type=f32)
             + conv_bb_ref[l])                                     # [B*T, H]
        conved = a * jax.nn.sigmoid(g)                             # GLU (no lane split)

        # --- attention ---
        conved_emb = (
            jnp.dot(conved, w_h2e_ref[...], preferred_element_type=f32)
            + b_h2e_ref[...]
        )                                                          # [B*T, E]
        combined = ((conved_emb + emb) * scale).reshape(B, T, E)   # [B, T, E]
        # energy: rhs already [E, S] per batch -> no in-kernel transpose.
        energy = jax.lax.dot_general(
            combined, encc_t, (((2,), (1,)), ((0,), (0,))),
            preferred_element_type=f32)                            # [B, T, S]
        m = jnp.max(energy, axis=-1, keepdims=True)
        p = jnp.exp(energy - m)
        denom = jnp.sum(p, axis=-1, keepdims=True)
        attn = p * pl.reciprocal(denom, approx=True)               # softmax (EUP recip)
        attended = jax.lax.dot_general(
            attn, encm, (((2,), (1,)), ((0,), (0,))),
            preferred_element_type=f32).reshape(B * T, E)          # [B*T, E]
        attended = (
            jnp.dot(attended, w_ae2h_ref[...], preferred_element_type=f32)
            + b_ae2h_ref[...]
        )                                                          # [B*T, H]
        conved = (conved + attended) * scale
        conv_input = (conved + conv_input) * scale                 # residual

    # --- output head: hid2emb then fc_out (lane-dense padded vocab) ---
    conved_e = (
        jnp.dot(conv_input, w_h2emb_ref[...], preferred_element_type=f32)
        + b_h2emb_ref[...]
    )                                                              # [B*T, E]
    logits = (
        jnp.dot(conved_e, w_fc_ref[...], preferred_element_type=f32)
        + b_fc_ref[...]
    )                                                              # [B*T, Vp]

    out_ref[...] = logits.astype(out_ref.dtype)
    attn_ref[...] = attn.astype(attn_ref.dtype)                    # last layer only


# ----------------------------------------------------------------------------
# Wrapper: layout plumbing + single fused pallas_call
# ----------------------------------------------------------------------------
def decoder_forward(params, trg, encoder_conved, encoder_combined,
                    *, kernel_size, trg_pad_idx, n_layers, scale, num_chunks=1):
    B, T = trg.shape
    E = params["tok_emb"].shape[1]
    H = params["w_emb2hid"].shape[1]
    V = params["w_fc"].shape[1]
    S = encoder_conved.shape[1]
    K = kernel_size
    L = n_layers
    assert B % num_chunks == 0
    Bc = B // num_chunks
    row_blk = Bc * T

    # Token + position embedding (gather stays in XLA); dropout == identity.
    pos = jnp.broadcast_to(jnp.arange(T), (B, T))
    embedded = params["tok_emb"][trg] + params["pos_emb"][pos]     # [B, T, E]
    emb_flat = embedded.reshape(B * T, E)

    # Pre-transpose encoder_conved ONCE: [B, S, E] -> [B, E, S].
    encc_t = jnp.transpose(encoder_conved, (0, 2, 1))

    # Layer-stacked conv weights, split into GLU halves, im2col layout [K*H, H].
    conv_w = jnp.stack(params["conv_w"])                           # [L, K, H, 2H]
    conv_wa = conv_w[..., :H].reshape(L, K * H, H)
    conv_wb = conv_w[..., H:].reshape(L, K * H, H)
    conv_b = jnp.stack(params["conv_b"])                           # [L, 2H]
    conv_ba = conv_b[:, :H].reshape(L, 1, H)
    conv_bb = conv_b[:, H:].reshape(L, 1, H)

    # Pad vocab projection to a 128-lane multiple for lane-dense stores.
    Vp = ((V + 127) // 128) * 128
    w_fc = jnp.pad(params["w_fc"], ((0, 0), (0, Vp - V)))
    b_fc = jnp.pad(params["b_fc"], ((0, Vp - V),)).reshape(1, Vp)

    kernel = functools.partial(
        _fused_decoder_kernel, B=Bc, T=T, K=K, H=H, E=E,
        n_layers=L, scale=scale, pad_value=float(trg_pad_idx))

    logits, attn = pl.pallas_call(
        kernel,
        out_shape=(
            jax.ShapeDtypeStruct((B * T, Vp), jnp.float32),
            jax.ShapeDtypeStruct((B, T, S), jnp.float32),
        ),
        grid=(num_chunks,),
        in_specs=[
            pl.BlockSpec((row_blk, E), lambda i: (i, 0)),          # emb_flat
            pl.BlockSpec((Bc, E, S), lambda i: (i, 0, 0)),         # encc_t
            pl.BlockSpec((Bc, S, E), lambda i: (i, 0, 0)),         # enc_combined
            pl.BlockSpec((E, H), lambda i: (0, 0)),                # w_emb2hid
            pl.BlockSpec((1, H), lambda i: (0, 0)),                # b_emb2hid
            pl.BlockSpec((L, K * H, H), lambda i: (0, 0, 0)),      # conv_wa
            pl.BlockSpec((L, K * H, H), lambda i: (0, 0, 0)),      # conv_wb
            pl.BlockSpec((L, 1, H), lambda i: (0, 0, 0)),          # conv_ba
            pl.BlockSpec((L, 1, H), lambda i: (0, 0, 0)),          # conv_bb
            pl.BlockSpec((H, E), lambda i: (0, 0)),                # w_attn_h2e
            pl.BlockSpec((1, E), lambda i: (0, 0)),                # b_attn_h2e
            pl.BlockSpec((E, H), lambda i: (0, 0)),                # w_attn_e2h
            pl.BlockSpec((1, H), lambda i: (0, 0)),                # b_attn_e2h
            pl.BlockSpec((H, E), lambda i: (0, 0)),                # w_hid2emb
            pl.BlockSpec((1, E), lambda i: (0, 0)),                # b_hid2emb
            pl.BlockSpec((E, Vp), lambda i: (0, 0)),               # w_fc (padded)
            pl.BlockSpec((1, Vp), lambda i: (0, 0)),               # b_fc (padded)
        ],
        out_specs=(
            pl.BlockSpec((row_blk, Vp), lambda i: (i, 0)),
            pl.BlockSpec((Bc, T, S), lambda i: (i, 0, 0)),
        ),
        compiler_params=pltpu.CompilerParams(
            dimension_semantics=("parallel",),   # v7x: num_chunks=2 feeds both TCs
        ),
    )(emb_flat, encc_t, encoder_combined,
      params["w_emb2hid"], params["b_emb2hid"].reshape(1, H),
      conv_wa, conv_wb, conv_ba, conv_bb,
      params["w_attn_h2e"], params["b_attn_h2e"].reshape(1, E),
      params["w_attn_e2h"], params["b_attn_e2h"].reshape(1, H),
      params["w_hid2emb"], params["b_hid2emb"].reshape(1, E),
      w_fc, b_fc)

    output = logits.reshape(B, T, Vp)[:, :, :V]
    return output, attn


# ----------------------------------------------------------------------------
# Pure-JAX reference (mirrors the PyTorch forward), for correctness check
# ----------------------------------------------------------------------------
def decoder_reference(params, trg, enc_conved, enc_combined,
                      *, kernel_size, trg_pad_idx, n_layers, scale):
    B, T = trg.shape
    H = params["w_emb2hid"].shape[1]
    pos = jnp.broadcast_to(jnp.arange(T), (B, T))
    embedded = params["tok_emb"][trg] + params["pos_emb"][pos]
    conv_input = embedded @ params["w_emb2hid"] + params["b_emb2hid"]
    attn = None
    for i in range(n_layers):
        pad = jnp.full((B, kernel_size - 1, H), float(trg_pad_idx), conv_input.dtype)
        padded = jnp.concatenate([pad, conv_input], axis=1)
        conved = jnp.zeros((B, T, 2 * H), jnp.float32)
        for k in range(kernel_size):
            conved = conved + padded[:, k:k + T, :] @ params["conv_w"][i][k]
        conved = conved + params["conv_b"][i]
        conved = conved[..., :H] * jax.nn.sigmoid(conved[..., H:])
        conved_emb = conved @ params["w_attn_h2e"] + params["b_attn_h2e"]
        combined = (conved_emb + embedded) * scale
        energy = jnp.einsum("bte,bse->bts", combined, enc_conved)
        attn = jax.nn.softmax(energy, axis=-1)
        attended = jnp.einsum("bts,bse->bte", attn, enc_combined)
        attended = attended @ params["w_attn_e2h"] + params["b_attn_e2h"]
        conved = (conved + attended) * scale
        conv_input = (conved + conv_input) * scale
    conved = conv_input @ params["w_hid2emb"] + params["b_hid2emb"]
    output = conved @ params["w_fc"] + params["b_fc"]
    return output, attn


# ----------------------------------------------------------------------------
if __name__ == "__main__":
    # Small config consistent with the module's __init__
    output_dim = 50     # vocab size
    emb_dim = 32
    hid_dim = 64
    n_layers = 2
    kernel_size = 3
    trg_pad_idx = 1
    max_length = 61
    scale = float(jnp.sqrt(0.5))

    B, T, S = 2, 8, 10   # batch, target length, source length

    key = jax.random.PRNGKey(0)
    ks = jax.random.split(key, 16)

    def init(k, shape, s=0.1):
        return (jax.random.normal(k, shape, jnp.float32) * s)

    params = {
        "tok_emb": init(ks[0], (output_dim, emb_dim)),
        "pos_emb": init(ks[1], (max_length, emb_dim)),
        "w_emb2hid": init(ks[2], (emb_dim, hid_dim)),
        "b_emb2hid": init(ks[3], (hid_dim,)),
        "w_hid2emb": init(ks[4], (hid_dim, emb_dim)),
        "b_hid2emb": init(ks[5], (emb_dim,)),
        "w_attn_h2e": init(ks[6], (hid_dim, emb_dim)),
        "b_attn_h2e": init(ks[7], (emb_dim,)),
        "w_attn_e2h": init(ks[8], (emb_dim, hid_dim)),
        "b_attn_e2h": init(ks[9], (hid_dim,)),
        "w_fc": init(ks[10], (emb_dim, output_dim)),
        "b_fc": init(ks[11], (output_dim,)),
        # conv weights per layer, channels-last: [K, H_in, 2*H_out]
        "conv_w": [init(jax.random.fold_in(ks[12], i),
                        (kernel_size, hid_dim, 2 * hid_dim))
                   for i in range(n_layers)],
        "conv_b": [init(jax.random.fold_in(ks[13], i), (2 * hid_dim,))
                   for i in range(n_layers)],
    }

    trg = jax.random.randint(ks[14], (B, T), 0, output_dim, dtype=jnp.int32)
    kk = jax.random.split(ks[15], 2)
    encoder_conved = init(kk[0], (B, S, emb_dim), s=1.0)
    encoder_combined = init(kk[1], (B, S, emb_dim), s=1.0)

    ref_out, ref_attn = decoder_reference(
        params, trg, encoder_conved, encoder_combined,
        kernel_size=kernel_size, trg_pad_idx=trg_pad_idx,
        n_layers=n_layers, scale=scale,
    )

    # Tolerance is 2e-3 because the softmax denominator uses the EUP
    # approximate reciprocal (pl.reciprocal(approx=True)).
    for num_chunks in (1, 2):   # 1 = single fused call; 2 = v7x megacore split
        out, attn = decoder_forward(
            params, trg, encoder_conved, encoder_combined,
            kernel_size=kernel_size, trg_pad_idx=trg_pad_idx,
            n_layers=n_layers, scale=scale, num_chunks=num_chunks,
        )
        out = jax.block_until_ready(out)
        attn = jax.block_until_ready(attn)
        assert out.shape == (B, T, output_dim)
        assert attn.shape == (B, T, S)
        assert jnp.allclose(out, ref_out, rtol=2e-3, atol=2e-3)
        assert jnp.allclose(attn, ref_attn, rtol=2e-3, atol=2e-3)

    print("KERNEL_OK")
</pallas_src>

<mosaic_0001>
module attributes {stable_mosaic.version = 11 : i64} {
  func.func @_fused_decoder_kernel(%arg0: i32, %arg1: memref<16x32xf32, #tpu.memory_space<vmem>>, %arg2: memref<2x32x10xf32, #tpu.memory_space<vmem>>, %arg3: memref<2x10x32xf32, #tpu.memory_space<vmem>>, %arg4: memref<32x64xf32, #tpu.memory_space<vmem>>, %arg5: memref<1x64xf32, #tpu.memory_space<vmem>>, %arg6: memref<2x192x64xf32, #tpu.memory_space<vmem>>, %arg7: memref<2x192x64xf32, #tpu.memory_space<vmem>>, %arg8: memref<2x1x64xf32, #tpu.memory_space<vmem>>, %arg9: memref<2x1x64xf32, #tpu.memory_space<vmem>>, %arg10: memref<64x32xf32, #tpu.memory_space<vmem>>, %arg11: memref<1x32xf32, #tpu.memory_space<vmem>>, %arg12: memref<32x64xf32, #tpu.memory_space<vmem>>, %arg13: memref<1x64xf32, #tpu.memory_space<vmem>>, %arg14: memref<64x32xf32, #tpu.memory_space<vmem>>, %arg15: memref<1x32xf32, #tpu.memory_space<vmem>>, %arg16: memref<32x128xf32, #tpu.memory_space<vmem>>, %arg17: memref<1x128xf32, #tpu.memory_space<vmem>>, %arg18: memref<16x128xf32, #tpu.memory_space<vmem>>, %arg19: memref<2x8x10xf32, #tpu.memory_space<vmem>>) attributes {dimension_semantics = [#tpu.dimension_semantics<parallel>], iteration_bounds = array<i64: 1>, scalar_prefetch = 0 : i64, scratch_operands = 0 : i64, tpu.core_type = #tpu.core_type<tc>, window_params = [{transform_indices = @transform_0, window_bounds = array<i64: 16, 32>}, {transform_indices = @transform_1, window_bounds = array<i64: 2, 32, 10>}, {transform_indices = @transform_2, window_bounds = array<i64: 2, 10, 32>}, {pipeline_mode = #tpu.pipeline_mode<synchronous>, transform_indices = @transform_3, window_bounds = array<i64: 32, 64>}, {pipeline_mode = #tpu.pipeline_mode<synchronous>, transform_indices = @transform_4, window_bounds = array<i64: 1, 64>}, {pipeline_mode = #tpu.pipeline_mode<synchronous>, transform_indices = @transform_5, window_bounds = array<i64: 2, 192, 64>}, {pipeline_mode = #tpu.pipeline_mode<synchronous>, transform_indices = @transform_6, window_bounds = array<i64: 2, 192, 64>}, {pipeline_mode = #tpu.pipeline_mode<synchronous>, transform_indices = @transform_7, window_bounds = array<i64: 2, 1, 64>}, {pipeline_mode = #tpu.pipeline_mode<synchronous>, transform_indices = @transform_8, window_bounds = array<i64: 2, 1, 64>}, {pipeline_mode = #tpu.pipeline_mode<synchronous>, transform_indices = @transform_9, window_bounds = array<i64: 64, 32>}, {pipeline_mode = #tpu.pipeline_mode<synchronous>, transform_indices = @transform_10, window_bounds = array<i64: 1, 32>}, {pipeline_mode = #tpu.pipeline_mode<synchronous>, transform_indices = @transform_11, window_bounds = array<i64: 32, 64>}, {pipeline_mode = #tpu.pipeline_mode<synchronous>, transform_indices = @transform_12, window_bounds = array<i64: 1, 64>}, {pipeline_mode = #tpu.pipeline_mode<synchronous>, transform_indices = @transform_13, window_bounds = array<i64: 64, 32>}, {pipeline_mode = #tpu.pipeline_mode<synchronous>, transform_indices = @transform_14, window_bounds = array<i64: 1, 32>}, {pipeline_mode = #tpu.pipeline_mode<synchronous>, transform_indices = @transform_15, window_bounds = array<i64: 32, 128>}, {pipeline_mode = #tpu.pipeline_mode<synchronous>, transform_indices = @transform_16, window_bounds = array<i64: 1, 128>}, {transform_indices = @transform_17, window_bounds = array<i64: 16, 128>}, {transform_indices = @transform_18, window_bounds = array<i64: 2, 8, 10>}]} {
    %c0 = arith.constant 0 : index
    %c0_0 = arith.constant 0 : index
    %0 = vector.load %arg1[%c0, %c0_0] : memref<16x32xf32, #tpu.memory_space<vmem>>, vector<16x32xf32>
    %c0_1 = arith.constant 0 : index
    %c0_2 = arith.constant 0 : index
    %1 = vector.load %arg4[%c0_1, %c0_2] : memref<32x64xf32, #tpu.memory_space<vmem>>, vector<32x64xf32>
    %cst = arith.constant dense<0.000000e+00> : vector<16x64xf32>
    %2 = tpu.matmul %0, %1, %cst {dimension_numbers = #tpu.dot_dimension_numbers<[1], [0], [0], [1], [0, 0, 1, 1], [], []>} : vector<16x32xf32>, vector<32x64xf32>, vector<16x64xf32> -> vector<16x64xf32>
    %c0_3 = arith.constant 0 : index
    %c0_4 = arith.constant 0 : index
    %3 = vector.load %arg5[%c0_3, %c0_4] : memref<1x64xf32, #tpu.memory_space<vmem>>, vector<1x64xf32>
    %4 = vector.broadcast %3 : vector<1x64xf32> to vector<16x64xf32>
    %5 = arith.addf %2, %4 : vector<16x64xf32>
    %c0_5 = arith.constant 0 : index
    %c0_6 = arith.constant 0 : index
    %c0_7 = arith.constant 0 : index
    %6 = vector.load %arg2[%c0_5, %c0_6, %c0_7] : memref<2x32x10xf32, #tpu.memory_space<vmem>>, vector<2x32x10xf32>
    %c0_8 = arith.constant 0 : index
    %c0_9 = arith.constant 0 : index
    %c0_10 = arith.constant 0 : index
    %7 = vector.load %arg3[%c0_8, %c0_9, %c0_10] : memref<2x10x32xf32, #tpu.memory_space<vmem>>, vector<2x10x32xf32>
    %cst_11 = arith.constant 1.000000e+00 : f32
    %8 = vector.broadcast %cst_11 : f32 to vector<2x2x64xf32>
    %9 = vector.shape_cast %5 : vector<16x64xf32> to vector<2x8x64xf32>
    %10 = tpu.concatenate %8, %9 in 1 : vector<2x2x64xf32>, vector<2x8x64xf32> -> vector<2x10x64xf32>
    %11 = vector.extract_strided_slice %10 {offsets = [0, 0, 0], sizes = [2, 8, 64], strides = [1, 1, 1]} : vector<2x10x64xf32> to vector<2x8x64xf32>
    %12 = vector.extract_strided_slice %10 {offsets = [0, 1, 0], sizes = [2, 8, 64], strides = [1, 1, 1]} : vector<2x10x64xf32> to vector<2x8x64xf32>
    %13 = vector.extract_strided_slice %10 {offsets = [0, 2, 0], sizes = [2, 8, 64], strides = [1, 1, 1]} : vector<2x10x64xf32> to vector<2x8x64xf32>
    %14 = tpu.concatenate %11, %12, %13 in 2 : vector<2x8x64xf32>, vector<2x8x64xf32>, vector<2x8x64xf32> -> vector<2x8x192xf32>
    %15 = vector.shape_cast %14 : vector<2x8x192xf32> to vector<16x192xf32>
    %c0_12 = arith.constant 0 : index
    %c0_13 = arith.constant 0 : index
    %c0_14 = arith.constant 0 : index
    %16 = vector.load %arg6[%c0_12, %c0_13, %c0_14] : memref<2x192x64xf32, #tpu.memory_space<vmem>>, vector<1x192x64xf32>
    %17 = vector.shape_cast %16 : vector<1x192x64xf32> to vector<192x64xf32>
    %cst_15 = arith.constant dense<0.000000e+00> : vector<16x64xf32>
    %18 = tpu.matmul %15, %17, %cst_15 {dimension_numbers = #tpu.dot_dimension_numbers<[1], [0], [0], [1], [0, 0, 1, 1], [], []>} : vector<16x192xf32>, vector<192x64xf32>, vector<16x64xf32> -> vector<16x64xf32>
    %c0_16 = arith.constant 0 : index
    %c0_17 = arith.constant 0 : index
    %c0_18 = arith.constant 0 : index
    %19 = vector.load %arg8[%c0_16, %c0_17, %c0_18] : memref<2x1x64xf32, #tpu.memory_space<vmem>>, vector<1x1x64xf32>
    %20 = vector.shape_cast %19 : vector<1x1x64xf32> to vector<1x64xf32>
    %21 = vector.broadcast %20 : vector<1x64xf32> to vector<16x64xf32>
    %22 = arith.addf %18, %21 : vector<16x64xf32>
    %c0_19 = arith.constant 0 : index
    %c0_20 = arith.constant 0 : index
    %c0_21 = arith.constant 0 : index
    %23 = vector.load %arg7[%c0_19, %c0_20, %c0_21] : memref<2x192x64xf32, #tpu.memory_space<vmem>>, vector<1x192x64xf32>
    %24 = vector.shape_cast %23 : vector<1x192x64xf32> to vector<192x64xf32>
    %cst_22 = arith.constant dense<0.000000e+00> : vector<16x64xf32>
    %25 = tpu.matmul %15, %24, %cst_22 {dimension_numbers = #tpu.dot_dimension_numbers<[1], [0], [0], [1], [0, 0, 1, 1], [], []>} : vector<16x192xf32>, vector<192x64xf32>, vector<16x64xf32> -> vector<16x64xf32>
    %c0_23 = arith.constant 0 : index
    %c0_24 = arith.constant 0 : index
    %c0_25 = arith.constant 0 : index
    %26 = vector.load %arg9[%c0_23, %c0_24, %c0_25] : memref<2x1x64xf32, #tpu.memory_space<vmem>>, vector<1x1x64xf32>
    %27 = vector.shape_cast %26 : vector<1x1x64xf32> to vector<1x64xf32>
    %28 = vector.broadcast %27 : vector<1x64xf32> to vector<16x64xf32>
    %29 = arith.addf %25, %28 : vector<16x64xf32>
    %30 = arith.negf %29 : vector<16x64xf32>
    %31 = math.exp %30 : vector<16x64xf32>
    %cst_26 = arith.constant 1.000000e+00 : f32
    %32 = vector.broadcast %cst_26 : f32 to vector<16x64xf32>
    %33 = arith.addf %32, %31 : vector<16x64xf32>
    %34 = arith.divf %32, %33 : vector<16x64xf32>
    %35 = arith.mulf %22, %34 : vector<16x64xf32>
    %c0_27 = arith.constant 0 : index
    %c0_28 = arith.constant 0 : index
    %36 = vector.load %arg10[%c0_27, %c0_28] : memref<64x32xf32, #tpu.memory_space<vmem>>, vector<64x32xf32>
    %cst_29 = arith.constant dense<0.000000e+00> : vector<16x32xf32>
    %37 = tpu.matmul %35, %36, %cst_29 {dimension_numbers = #tpu.dot_dimension_numbers<[1], [0], [0], [1], [0, 0, 1, 1], [], []>} : vector<16x64xf32>, vector<64x32xf32>, vector<16x32xf32> -> vector<16x32xf32>
    %c0_30 = arith.constant 0 : index
    %c0_31 = arith.constant 0 : index
    %38 = vector.load %arg11[%c0_30, %c0_31] : memref<1x32xf32, #tpu.memory_space<vmem>>, vector<1x32xf32>
    %39 = vector.broadcast %38 : vector<1x32xf32> to vector<16x32xf32>
    %40 = arith.addf %37, %39 : vector<16x32xf32>
    %41 = arith.addf %40, %0 : vector<16x32xf32>
    %cst_32 = arith.constant 0.707106769 : f32
    %42 = vector.broadcast %cst_32 : f32 to vector<16x32xf32>
    %43 = arith.mulf %41, %42 : vector<16x32xf32>
    %44 = vector.shape_cast %43 : vector<16x32xf32> to vector<2x8x32xf32>
    %cst_33 = arith.constant dense<0.000000e+00> : vector<2x8x10xf32>
    %45 = tpu.matmul %44, %6, %cst_33 {dimension_numbers = #tpu.dot_dimension_numbers<[2], [1], [1], [2], [0, 0, 0, 1, 1, 2], [0], [0]>} : vector<2x8x32xf32>, vector<2x32x10xf32>, vector<2x8x10xf32> -> vector<2x8x10xf32>
    %cst_34 = arith.constant dense<0xFF800000> : vector<2x8xf32>
    %46 = vector.multi_reduction <maximumf>, %45, %cst_34 [2] : vector<2x8x10xf32> to vector<2x8xf32>
    %47 = vector.shape_cast %46 : vector<2x8xf32> to vector<2x8x1xf32>
    %48 = vector.broadcast %47 : vector<2x8x1xf32> to vector<2x8x10xf32>
    %49 = arith.subf %45, %48 : vector<2x8x10xf32>
    %50 = math.exp %49 : vector<2x8x10xf32>
    %cst_35 = arith.constant dense<0.000000e+00> : vector<2x8xf32>
    %51 = vector.multi_reduction <add>, %50, %cst_35 [2] : vector<2x8x10xf32> to vector<2x8xf32>
    %52 = vector.shape_cast %51 : vector<2x8xf32> to vector<2x8x1xf32>
    %53 = tpu.reciprocal %52 {approx = true} : vector<2x8x1xf32> -> vector<2x8x1xf32>
    %54 = vector.broadcast %53 : vector<2x8x1xf32> to vector<2x8x10xf32>
    %55 = arith.mulf %50, %54 : vector<2x8x10xf32>
    %cst_36 = arith.constant dense<0.000000e+00> : vector<2x8x32xf32>
    %56 = tpu.matmul %55, %7, %cst_36 {dimension_numbers = #tpu.dot_dimension_numbers<[2], [1], [1], [2], [0, 0, 0, 1, 1, 2], [0], [0]>} : vector<2x8x10xf32>, vector<2x10x32xf32>, vector<2x8x32xf32> -> vector<2x8x32xf32>
    %57 = vector.shape_cast %56 : vector<2x8x32xf32> to vector<16x32xf32>
    %c0_37 = arith.constant 0 : index
    %c0_38 = arith.constant 0 : index
    %58 = vector.load %arg12[%c0_37, %c0_38] : memref<32x64xf32, #tpu.memory_space<vmem>>, vector<32x64xf32>
    %cst_39 = arith.constant dense<0.000000e+00> : vector<16x64xf32>
    %59 = tpu.matmul %57, %58, %cst_39 {dimension_numbers = #tpu.dot_dimension_numbers<[1], [0], [0], [1], [0, 0, 1, 1], [], []>} : vector<16x32xf32>, vector<32x64xf32>, vector<16x64xf32> -> vector<16x64xf32>
    %c0_40 = arith.constant 0 : index
    %c0_41 = arith.constant 0 : index
    %60 = vector.load %arg13[%c0_40, %c0_41] : memref<1x64xf32, #tpu.memory_space<vmem>>, vector<1x64xf32>
    %61 = vector.broadcast %60 : vector<1x64xf32> to vector<16x64xf32>
    %62 = arith.addf %59, %61 : vector<16x64xf32>
    %63 = arith.addf %35, %62 : vector<16x64xf32>
    %cst_42 = arith.constant 0.707106769 : f32
    %64 = vector.broadcast %cst_42 : f32 to vector<16x64xf32>
    %65 = arith.mulf %63, %64 : vector<16x64xf32>
    %66 = arith.addf %65, %5 : vector<16x64xf32>
    %cst_43 = arith.constant 0.707106769 : f32
    %67 = vector.broadcast %cst_43 : f32 to vector<16x64xf32>
    %68 = arith.mulf %66, %67 : vector<16x64xf32>
    %69 = vector.shape_cast %68 : vector<16x64xf32> to vector<2x8x64xf32>
    %70 = tpu.concatenate %8, %69 in 1 : vector<2x2x64xf32>, vector<2x8x64xf32> -> vector<2x10x64xf32>
    %71 = vector.extract_strided_slice %70 {offsets = [0, 0, 0], sizes = [2, 8, 64], strides = [1, 1, 1]} : vector<2x10x64xf32> to vector<2x8x64xf32>
    %72 = vector.extract_strided_slice %70 {offsets = [0, 1, 0], sizes = [2, 8, 64], strides = [1, 1, 1]} : vector<2x10x64xf32> to vector<2x8x64xf32>
    %73 = vector.extract_strided_slice %70 {offsets = [0, 2, 0], sizes = [2, 8, 64], strides = [1, 1, 1]} : vector<2x10x64xf32> to vector<2x8x64xf32>
    %74 = tpu.concatenate %71, %72, %73 in 2 : vector<2x8x64xf32>, vector<2x8x64xf32>, vector<2x8x64xf32> -> vector<2x8x192xf32>
    %75 = vector.shape_cast %74 : vector<2x8x192xf32> to vector<16x192xf32>
    %c1 = arith.constant 1 : index
    %c0_44 = arith.constant 0 : index
    %c0_45 = arith.constant 0 : index
    %76 = vector.load %arg6[%c1, %c0_44, %c0_45] : memref<2x192x64xf32, #tpu.memory_space<vmem>>, vector<1x192x64xf32>
    %77 = vector.shape_cast %76 : vector<1x192x64xf32> to vector<192x64xf32>
    %cst_46 = arith.constant dense<0.000000e+00> : vector<16x64xf32>
    %78 = tpu.matmul %75, %77, %cst_46 {dimension_numbers = #tpu.dot_dimension_numbers<[1], [0], [0], [1], [0, 0, 1, 1], [], []>} : vector<16x192xf32>, vector<192x64xf32>, vector<16x64xf32> -> vector<16x64xf32>
    %c1_47 = arith.constant 1 : index
    %c0_48 = arith.constant 0 : index
    %c0_49 = arith.constant 0 : index
    %79 = vector.load %arg8[%c1_47, %c0_48, %c0_49] : memref<2x1x64xf32, #tpu.memory_space<vmem>>, vector<1x1x64xf32>
    %80 = vector.shape_cast %79 : vector<1x1x64xf32> to vector<1x64xf32>
    %81 = vector.broadcast %80 : vector<1x64xf32> to vector<16x64xf32>
    %82 = arith.addf %78, %81 : vector<16x64xf32>
    %c1_50 = arith.constant 1 : index
    %c0_51 = arith.constant 0 : index
    %c0_52 = arith.constant 0 : index
    %83 = vector.load %arg7[%c1_50, %c0_51, %c0_52] : memref<2x192x64xf32, #tpu.memory_space<vmem>>, vector<1x192x64xf32>
    %84 = vector.shape_cast %83 : vector<1x192x64xf32> to vector<192x64xf32>
    %cst_53 = arith.constant dense<0.000000e+00> : vector<16x64xf32>
    %85 = tpu.matmul %75, %84, %cst_53 {dimension_numbers = #tpu.dot_dimension_numbers<[1], [0], [0], [1], [0, 0, 1, 1], [], []>} : vector<16x192xf32>, vector<192x64xf32>, vector<16x64xf32> -> vector<16x64xf32>
    %c1_54 = arith.constant 1 : index
    %c0_55 = arith.constant 0 : index
    %c0_56 = arith.constant 0 : index
    %86 = vector.load %arg9[%c1_54, %c0_55, %c0_56] : memref<2x1x64xf32, #tpu.memory_space<vmem>>, vector<1x1x64xf32>
    %87 = vector.shape_cast %86 : vector<1x1x64xf32> to vector<1x64xf32>
    %88 = vector.broadcast %87 : vector<1x64xf32> to vector<16x64xf32>
    %89 = arith.addf %85, %88 : vector<16x64xf32>
    %90 = arith.negf %89 : vector<16x64xf32>
    %91 = math.exp %90 : vector<16x64xf32>
    %cst_57 = arith.constant 1.000000e+00 : f32
    %92 = vector.broadcast %cst_57 : f32 to vector<16x64xf32>
    %93 = arith.addf %92, %91 : vector<16x64xf32>
    %94 = arith.divf %92, %93 : vector<16x64xf32>
    %95 = arith.mulf %82, %94 : vector<16x64xf32>
    %c0_58 = arith.constant 0 : index
    %c0_59 = arith.constant 0 : index
    %96 = vector.load %arg10[%c0_58, %c0_59] : memref<64x32xf32, #tpu.memory_space<vmem>>, vector<64x32xf32>
    %cst_60 = arith.constant dense<0.000000e+00> : vector<16x32xf32>
    %97 = tpu.matmul %95, %96, %cst_60 {dimension_numbers = #tpu.dot_dimension_numbers<[1], [0], [0], [1], [0, 0, 1, 1], [], []>} : vector<16x64xf32>, vector<64x32xf32>, vector<16x32xf32> -> vector<16x32xf32>
    %c0_61 = arith.constant 0 : index
    %c0_62 = arith.constant 0 : index
    %98 = vector.load %arg11[%c0_61, %c0_62] : memref<1x32xf32, #tpu.memory_space<vmem>>, vector<1x32xf32>
    %99 = vector.broadcast %98 : vector<1x32xf32> to vector<16x32xf32>
    %100 = arith.addf %97, %99 : vector<16x32xf32>
    %101 = arith.addf %100, %0 : vector<16x32xf32>
    %cst_63 = arith.constant 0.707106769 : f32
    %102 = vector.broadcast %cst_63 : f32 to vector<16x32xf32>
    %103 = arith.mulf %101, %102 : vector<16x32xf32>
    %104 = vector.shape_cast %103 : vector<16x32xf32> to vector<2x8x32xf32>
    %cst_64 = arith.constant dense<0.000000e+00> : vector<2x8x10xf32>
    %105 = tpu.matmul %104, %6, %cst_64 {dimension_numbers = #tpu.dot_dimension_numbers<[2], [1], [1], [2], [0, 0, 0, 1, 1, 2], [0], [0]>} : vector<2x8x32xf32>, vector<2x32x10xf32>, vector<2x8x10xf32> -> vector<2x8x10xf32>
    %cst_65 = arith.constant dense<0xFF800000> : vector<2x8xf32>
    %106 = vector.multi_reduction <maximumf>, %105, %cst_65 [2] : vector<2x8x10xf32> to vector<2x8xf32>
    %107 = vector.shape_cast %106 : vector<2x8xf32> to vector<2x8x1xf32>
    %108 = vector.broadcast %107 : vector<2x8x1xf32> to vector<2x8x10xf32>
    %109 = arith.subf %105, %108 : vector<2x8x10xf32>
    %110 = math.exp %109 : vector<2x8x10xf32>
    %cst_66 = arith.constant dense<0.000000e+00> : vector<2x8xf32>
    %111 = vector.multi_reduction <add>, %110, %cst_66 [2] : vector<2x8x10xf32> to vector<2x8xf32>
    %112 = vector.shape_cast %111 : vector<2x8xf32> to vector<2x8x1xf32>
    %113 = tpu.reciprocal %112 {approx = true} : vector<2x8x1xf32> -> vector<2x8x1xf32>
    %114 = vector.broadcast %113 : vector<2x8x1xf32> to vector<2x8x10xf32>
    %115 = arith.mulf %110, %114 : vector<2x8x10xf32>
    %cst_67 = arith.constant dense<0.000000e+00> : vector<2x8x32xf32>
    %116 = tpu.matmul %115, %7, %cst_67 {dimension_numbers = #tpu.dot_dimension_numbers<[2], [1], [1], [2], [0, 0, 0, 1, 1, 2], [0], [0]>} : vector<2x8x10xf32>, vector<2x10x32xf32>, vector<2x8x32xf32> -> vector<2x8x32xf32>
    %117 = vector.shape_cast %116 : vector<2x8x32xf32> to vector<16x32xf32>
    %c0_68 = arith.constant 0 : index
    %c0_69 = arith.constant 0 : index
    %118 = vector.load %arg12[%c0_68, %c0_69] : memref<32x64xf32, #tpu.memory_space<vmem>>, vector<32x64xf32>
    %cst_70 = arith.constant dense<0.000000e+00> : vector<16x64xf32>
    %119 = tpu.matmul %117, %118, %cst_70 {dimension_numbers = #tpu.dot_dimension_numbers<[1], [0], [0], [1], [0, 0, 1, 1], [], []>} : vector<16x32xf32>, vector<32x64xf32>, vector<16x64xf32> -> vector<16x64xf32>
    %c0_71 = arith.constant 0 : index
    %c0_72 = arith.constant 0 : index
    %120 = vector.load %arg13[%c0_71, %c0_72] : memref<1x64xf32, #tpu.memory_space<vmem>>, vector<1x64xf32>
    %121 = vector.broadcast %120 : vector<1x64xf32> to vector<16x64xf32>
    %122 = arith.addf %119, %121 : vector<16x64xf32>
    %123 = arith.addf %95, %122 : vector<16x64xf32>
    %cst_73 = arith.constant 0.707106769 : f32
    %124 = vector.broadcast %cst_73 : f32 to vector<16x64xf32>
    %125 = arith.mulf %123, %124 : vector<16x64xf32>
    %126 = arith.addf %125, %68 : vector<16x64xf32>
    %cst_74 = arith.constant 0.707106769 : f32
    %127 = vector.broadcast %cst_74 : f32 to vector<16x64xf32>
    %128 = arith.mulf %126, %127 : vector<16x64xf32>
    %c0_75 = arith.constant 0 : index
    %c0_76 = arith.constant 0 : index
    %129 = vector.load %arg14[%c0_75, %c0_76] : memref<64x32xf32, #tpu.memory_space<vmem>>, vector<64x32xf32>
    %cst_77 = arith.constant dense<0.000000e+00> : vector<16x32xf32>
    %130 = tpu.matmul %128, %129, %cst_77 {dimension_numbers = #tpu.dot_dimension_numbers<[1], [0], [0], [1], [0, 0, 1, 1], [], []>} : vector<16x64xf32>, vector<64x32xf32>, vector<16x32xf32> -> vector<16x32xf32>
    %c0_78 = arith.constant 0 : index
    %c0_79 = arith.constant 0 : index
    %131 = vector.load %arg15[%c0_78, %c0_79] : memref<1x32xf32, #tpu.memory_space<vmem>>, vector<1x32xf32>
    %132 = vector.broadcast %131 : vector<1x32xf32> to vector<16x32xf32>
    %133 = arith.addf %130, %132 : vector<16x32xf32>
    %c0_80 = arith.constant 0 : index
    %c0_81 = arith.constant 0 : index
    %134 = vector.load %arg16[%c0_80, %c0_81] : memref<32x128xf32, #tpu.memory_space<vmem>>, vector<32x128xf32>
    %cst_82 = arith.constant dense<0.000000e+00> : vector<16x128xf32>
    %135 = tpu.matmul %133, %134, %cst_82 {dimension_numbers = #tpu.dot_dimension_numbers<[1], [0], [0], [1], [0, 0, 1, 1], [], []>} : vector<16x32xf32>, vector<32x128xf32>, vector<16x128xf32> -> vector<16x128xf32>
    %c0_83 = arith.constant 0 : index
    %c0_84 = arith.constant 0 : index
    %136 = vector.load %arg17[%c0_83, %c0_84] : memref<1x128xf32, #tpu.memory_space<vmem>>, vector<1x128xf32>
    %137 = vector.broadcast %136 : vector<1x128xf32> to vector<16x128xf32>
    %138 = arith.addf %135, %137 : vector<16x128xf32>
    %c0_85 = arith.constant 0 : index
    %c0_86 = arith.constant 0 : index
    %139 = vector.load %arg18[%c0_85, %c0_86] : memref<16x128xf32, #tpu.memory_space<vmem>>, vector<16x128xf32>
    tpu.vector_store %arg18[%c0_85, %c0_86], %138 {strides = array<i32>} : memref<16x128xf32, #tpu.memory_space<vmem>>, vector<16x128xf32>,
    %c0_87 = arith.constant 0 : index
    %c0_88 = arith.constant 0 : index
    %c0_89 = arith.constant 0 : index
    %140 = vector.load %arg19[%c0_87, %c0_88, %c0_89] : memref<2x8x10xf32, #tpu.memory_space<vmem>>, vector<2x8x10xf32>
    tpu.vector_store %arg19[%c0_87, %c0_88, %c0_89], %115 {strides = array<i32>} : memref<2x8x10xf32, #tpu.memory_space<vmem>>, vector<2x8x10xf32>,
    return
  }
  func.func @transform_0(%arg0: i32) -> (i32, i32) {
    %c0_i32 = arith.constant 0 : i32
    %c0_i32_0 = arith.constant 0 : i32
    return %arg0, %c0_i32 : i32, i32
  }
  func.func @transform_1(%arg0: i32) -> (i32, i32, i32) {
    %c0_i32 = arith.constant 0 : i32
    %c0_i32_0 = arith.constant 0 : i32
    %c0_i32_1 = arith.constant 0 : i32
    return %arg0, %c0_i32, %c0_i32_0 : i32, i32, i32
  }
  func.func @transform_2(%arg0: i32) -> (i32, i32, i32) {
    %c0_i32 = arith.constant 0 : i32
    %c0_i32_0 = arith.constant 0 : i32
    %c0_i32_1 = arith.constant 0 : i32
    return %arg0, %c0_i32, %c0_i32_0 : i32, i32, i32
  }
  func.func @transform_3(%arg0: i32) -> (i32, i32) {
    %c0_i32 = arith.constant 0 : i32
    %c0_i32_0 = arith.constant 0 : i32
    %c0_i32_1 = arith.constant 0 : i32
    return %c0_i32, %c0_i32_0 : i32, i32
  }
  func.func @transform_4(%arg0: i32) -> (i32, i32) {
    %c0_i32 = arith.constant 0 : i32
    %c0_i32_0 = arith.constant 0 : i32
    %c0_i32_1 = arith.constant 0 : i32
    return %c0_i32, %c0_i32_0 : i32, i32
  }
  func.func @transform_5(%arg0: i32) -> (i32, i32, i32) {
    %c0_i32 = arith.constant 0 : i32
    %c0_i32_0 = arith.constant 0 : i32
    %c0_i32_1 = arith.constant 0 : i32
    %c0_i32_2 = arith.constant 0 : i32
    return %c0_i32, %c0_i32_0, %c0_i32_1 : i32, i32, i32
  }
  func.func @transform_6(%arg0: i32) -> (i32, i32, i32) {
    %c0_i32 = arith.constant 0 : i32
    %c0_i32_0 = arith.constant 0 : i32
    %c0_i32_1 = arith.constant 0 : i32
    %c0_i32_2 = arith.constant 0 : i32
    return %c0_i32, %c0_i32_0, %c0_i32_1 : i32, i32, i32
  }
  func.func @transform_7(%arg0: i32) -> (i32, i32, i32) {
    %c0_i32 = arith.constant 0 : i32
    %c0_i32_0 = arith.constant 0 : i32
    %c0_i32_1 = arith.constant 0 : i32
    %c0_i32_2 = arith.constant 0 : i32
    return %c0_i32, %c0_i32_0, %c0_i32_1 : i32, i32, i32
  }
  func.func @transform_8(%arg0: i32) -> (i32, i32, i32) {
    %c0_i32 = arith.constant 0 : i32
    %c0_i32_0 = arith.constant 0 : i32
    %c0_i32_1 = arith.constant 0 : i32
    %c0_i32_2 = arith.constant 0 : i32
    return %c0_i32, %c0_i32_0, %c0_i32_1 : i32, i32, i32
  }
  func.func @transform_9(%arg0: i32) -> (i32, i32) {
    %c0_i32 = arith.constant 0 : i32
    %c0_i32_0 = arith.constant 0 : i32
    %c0_i32_1 = arith.constant 0 : i32
    return %c0_i32, %c0_i32_0 : i32, i32
  }
  func.func @transform_10(%arg0: i32) -> (i32, i32) {
    %c0_i32 = arith.constant 0 : i32
    %c0_i32_0 = arith.constant 0 : i32
    %c0_i32_1 = arith.constant 0 : i32
    return %c0_i32, %c0_i32_0 : i32, i32
  }
  func.func @transform_11(%arg0: i32) -> (i32, i32) {
    %c0_i32 = arith.constant 0 : i32
    %c0_i32_0 = arith.constant 0 : i32
    %c0_i32_1 = arith.constant 0 : i32
    return %c0_i32, %c0_i32_0 : i32, i32
  }
  func.func @transform_12(%arg0: i32) -> (i32, i32) {
    %c0_i32 = arith.constant 0 : i32
    %c0_i32_0 = arith.constant 0 : i32
    %c0_i32_1 = arith.constant 0 : i32
    return %c0_i32, %c0_i32_0 : i32, i32
  }
  func.func @transform_13(%arg0: i32) -> (i32, i32) {
    %c0_i32 = arith.constant 0 : i32
    %c0_i32_0 = arith.constant 0 : i32
    %c0_i32_1 = arith.constant 0 : i32
    return %c0_i32, %c0_i32_0 : i32, i32
  }
  func.func @transform_14(%arg0: i32) -> (i32, i32) {
    %c0_i32 = arith.constant 0 : i32
    %c0_i32_0 = arith.constant 0 : i32
    %c0_i32_1 = arith.constant 0 : i32
    return %c0_i32, %c0_i32_0 : i32, i32
  }
  func.func @transform_15(%arg0: i32) -> (i32, i32) {
    %c0_i32 = arith.constant 0 : i32
    %c0_i32_0 = arith.constant 0 : i32
    %c0_i32_1 = arith.constant 0 : i32
    return %c0_i32, %c0_i32_0 : i32, i32
  }
  func.func @transform_16(%arg0: i32) -> (i32, i32) {
    %c0_i32 = arith.constant 0 : i32
    %c0_i32_0 = arith.constant 0 : i32
    %c0_i32_1 = arith.constant 0 : i32
    return %c0_i32, %c0_i32_0 : i32, i32
  }
  func.func @transform_17(%arg0: i32) -> (i32, i32) {
    %c0_i32 = arith.constant 0 : i32
    %c0_i32_0 = arith.constant 0 : i32
    return %arg0, %c0_i32 : i32, i32
  }
  func.func @transform_18(%arg0: i32) -> (i32, i32, i32) {
    %c0_i32 = arith.constant 0 : i32
    %c0_i32_0 = arith.constant 0 : i32
    %c0_i32_1 = arith.constant 0 : i32
    return %arg0, %c0_i32, %c0_i32_0 : i32, i32, i32
  }
}

</mosaic_0001>

<bundles_post_ra>
// kernel: tpu_custom_call.1
= control target key start
LH: loop header
LB: loop body
LE: loop exit
PB: predicated region body
PF: predicated region fallthrough
CT: control target
= control target key end

     0   :  { %s3475_s0 = inlined_call_operand.vmem [shape: f32[16,32], index: 0, kind: input, shape index: {}]   ;;  %s3476_s1 = inlined_call_operand.vmem [shape: f32[2,32,10], index: 1, kind: input, shape index: {}]   ;;  %s3477_s2 = inlined_call_operand.vmem [shape: f32[2,10,32], index: 2, kind: input, shape index: {}]   ;;  %s3478_s3 = inlined_call_operand.vmem [shape: f32[32,64], index: 3, kind: input, shape index: {}]   ;;  %s3479_s4 = inlined_call_operand.vmem [shape: f32[1,64], index: 4, kind: input, shape index: {}]   ;;  %s3480_s5 = inlined_call_operand.vmem [shape: f32[2,192,64], index: 5, kind: input, shape index: {}]   ;;  %s3481_s6 = inlined_call_operand.vmem [shape: f32[2,192,64], index: 6, kind: input, shape index: {}]   ;;  %s3482_s7 = inlined_call_operand.vmem [shape: f32[2,1,64], index: 7, kind: input, shape index: {}]   ;;  %s3483_s8 = inlined_call_operand.vmem [shape: f32[2,1,64], index: 8, kind: input, shape index: {}]   ;;  %s3484_s9 = inlined_call_operand.vmem [shape: f32[64,32], index: 9, kind: input, shape index: {}]   ;;  %s3485_s10 = inlined_call_operand.vmem [shape: f32[1,32], index: 10, kind: input, shape index: {}]   ;;  %s3486_s11 = inlined_call_operand.vmem [shape: f32[32,64], index: 11, kind: input, shape index: {}]   ;;  %s3487_s12 = inlined_call_operand.vmem [shape: f32[1,64], index: 12, kind: input, shape index: {}]   ;;  %s3488_s13 = inlined_call_operand.vmem [shape: f32[64,32], index: 13, kind: input, shape index: {}]   ;;  %s3489_s14 = inlined_call_operand.vmem [shape: f32[1,32], index: 14, kind: input, shape index: {}]   ;;  %s3490_s15 = inlined_call_operand.vmem [shape: f32[32,128], index: 15, kind: input, shape index: {}]   ;;  %s3491_s16 = inlined_call_operand.vmem [shape: f32[1,128], index: 16, kind: input, shape index: {}]   ;;  %s3492_s17 = inlined_call_operand.hbm [shape: f32[16,128], index: 17, kind: output, shape index: {0}]   ;;  %s3493_s18 = inlined_call_operand.hbm [shape: f32[2,8,10], index: 18, kind: output, shape index: {1}]  }
   0x1   :  { %3497 = sst [smem:[#allocation8_spill]] %s3475_s0 }
   0x2   :  { %3498 = sst [smem:[#allocation9_spill]] %s3476_s1 }
   0x3   :  { %3499 = sst [smem:[#allocation10_spill]] %s3477_s2 }
   0x4   :  { %24 = vsyncpa [#allocation3], 0  ;;  %v62_v0 = vld [vmem:[%s3478_s3] sm:$0xff]  ;;  %v63_v1 = vld [vmem:[%s3478_s3 + $0x8] sm:$0xff]  ;;  %vm73_vm0 = vcmask 261120   ;;  %s3500_s2 = sld [smem:[#allocation8_spill]] }
   0x5   :  { %v64_v2 = vld [vmem:[%s3478_s3 + $0x10] sm:$0xff]  ;;  %v2284_v3 = vpack.c.bf16 %v63_v1, %v62_v0  ;;  %v65_v4 = vld [vmem:[%s3478_s3 + $0x18] sm:$0xff] }
   0x6   :  { %v2288_v6 = vpack.c.bf16 %v65_v4, %v64_v2 }
   0xa   :  { %v2758_v5 = vld [vmem:[%s3500_s2] sm:$0xff] }
   0xb   :  { %2119 = vmatprep.mubr.msk.f32.mxu0 %vm73_vm0, %v2758_v5 }
   0xc   :  { %25 = vsyncpa [#allocation5], 0  ;;  %2285 = vmatprep.subr.bf16.mxu0 %v2284_v3  ;;  %v2765_v7 = vld [vmem:[%s3500_s2 + $0x8] sm:$0xff]  ;;  %v201_v8 = vld [vmem:[%s3480_s5] sm:$0xff]  ;;  %v2639_v11 = vmov 0.0|0.0   ;;  %vm173_vm1 = vcmask 1041408  }
   0xd   :  { %2287 = vmatpush3.bf16.msra.mxu0 %v2284_v3  ;;  %v202_v9 = vld [vmem:[%s3480_s5 + $0x8] sm:$0xff]  ;;  %v311_v10 = vld [vmem:[%s3481_s6] sm:$0xff]  ;;  %2292 = vmatprep.subr.bf16.mxu1 %v2639_v11  ;;  %v203_v14 = vld [vmem:[%s3480_s5 + $0x10] sm:$0xff]  ;;  %vm191_vm2 = vcmask 1045504   ;;  %vm178_vm3 = vcmask 1046528   ;;  %vm198_vm4 = vcmask 523264  }
   0xe   :  { %2289 = vmatprep.subr.bf16.mxu0 %v2288_v6  ;;  %v2293_v12 = vpack.c.bf16 %v202_v9, %v201_v8  ;;  %v312_v13 = vld [vmem:[%s3481_s6 + $0x8] sm:$0xff]  ;;  %v204_v15 = vld [vmem:[%s3480_s5 + $0x18] sm:$0xff]  ;;  %v313_v17 = vld [vmem:[%s3481_s6 + $0x10] sm:$0xff]  ;;  %s3501_s24 = sld [smem:[#allocation9_spill]]  ;;  %vm2641_vm5 = vmmov 0   ;;  %vm677_vm6 = vcmask 80896  }
   0xf   :  { %v2329_v16 = vpack.c.bf16 %v312_v13, %v311_v10  ;;  %v314_v18 = vld [vmem:[%s3481_s6 + $0x18] sm:$0xff]  ;;  %v2296_v19 = vpack.c.bf16 %v204_v15, %v203_v14  ;;  %v205_v21 = vld [vmem:[%s3480_s5 + $0x20] sm:$0xff]  ;;  %v206_v22 = vld [vmem:[%s3480_s5 + $0x28] sm:$0xff]  ;;  %s3502_s25 = sld [smem:[#allocation10_spill]]  ;;  %vm2643_vm7 = vmmov 1  }
  0x10   :  { %2294 = vmatpush1.bf16.msra.mxu1 %v2293_v12  ;;  %v2332_v20 = vpack.c.bf16 %v314_v18, %v313_v17  ;;  %v315_v23 = vld [vmem:[%s3481_s6 + $0x20] sm:$0xff]  ;;  %v316_v24 = vld [vmem:[%s3481_s6 + $0x28] sm:$0xff]  ;;  %v2299_v25 = vpack.c.bf16 %v206_v22, %v205_v21  ;;  %v207_v27 = vld [vmem:[%s3480_s5 + $0x30] sm:$0xff] }
  0x11   :  { %2291 = vmatpush3.bf16.msra.mxu0 %v2288_v6  ;;  %2295 = vmatprep.subr.bf16.mxu1 %v2639_v11  ;;  %v2335_v26 = vpack.c.bf16 %v316_v24, %v315_v23  ;;  %v208_v28 = vld [vmem:[%s3480_s5 + $0x38] sm:$0xff]  ;;  %v317_v29 = vld [vmem:[%s3481_s6 + $0x30] sm:$0xff]  ;;  %v209_v33 = vld [vmem:[%s3480_s5 + $0x40] sm:$0xff] }
  0x12   :  { %2328 = vmatprep.subr.bf16.mxu0 %v2639_v11  ;;  %v318_v30 = vld [vmem:[%s3481_s6 + $0x38] sm:$0xff]  ;;  %v2302_v31 = vpack.c.bf16 %v208_v28, %v207_v27  ;;  %v210_v34 = vld [vmem:[%s3480_s5 + $0x48] sm:$0xff]  ;;  %v319_v35 = vld [vmem:[%s3481_s6 + $0x40] sm:$0xff] }
  0x13   :  { %v2338_v32 = vpack.c.bf16 %v318_v30, %v317_v29  ;;  %v320_v36 = vld [vmem:[%s3481_s6 + $0x48] sm:$0xff]  ;;  %v2305_v37 = vpack.c.bf16 %v210_v34, %v209_v33  ;;  %v211_v39 = vld [vmem:[%s3480_s5 + $0x50] sm:$0xff]  ;;  %v212_v40 = vld [vmem:[%s3480_s5 + $0x58] sm:$0xff] }
  0x14   :  { %2120 = vmatmul.mubr.msk.f32.vlgmr.msra.gmra.mrb[0].mxu0 %vm73_vm0, %v2765_v7  ;;  %2297 = vmatpush1.bf16.msra.mxu1 %v2296_v19  ;;  %v2341_v38 = vpack.c.bf16 %v320_v36, %v319_v35  ;;  %v321_v41 = vld [vmem:[%s3481_s6 + $0x50] sm:$0xff]  ;;  %v322_v42 = vld [vmem:[%s3481_s6 + $0x58] sm:$0xff]  ;;  %v2308_v43 = vpack.c.bf16 %v212_v40, %v211_v39  ;;  %v213_v45 = vld [vmem:[%s3480_s5 + $0x60] sm:$0xff] }
  0x15   :  { %2330 = vmatpush1.bf16.msra.mxu0 %v2329_v16  ;;  %2298 = vmatprep.subr.bf16.mxu1 %v2639_v11  ;;  %v2344_v44 = vpack.c.bf16 %v322_v42, %v321_v41  ;;  %v214_v46 = vld [vmem:[%s3480_s5 + $0x68] sm:$0xff]  ;;  %v323_v47 = vld [vmem:[%s3481_s6 + $0x60] sm:$0xff]  ;;  %v215_v51 = vld [vmem:[%s3480_s5 + $0x70] sm:$0xff] }
  0x16   :  { %2331 = vmatprep.subr.bf16.mxu0 %v2639_v11  ;;  %v324_v48 = vld [vmem:[%s3481_s6 + $0x68] sm:$0xff]  ;;  %v2311_v49 = vpack.c.bf16 %v214_v46, %v213_v45  ;;  %v216_v52 = vld [vmem:[%s3480_s5 + $0x78] sm:$0xff]  ;;  %v325_v53 = vld [vmem:[%s3481_s6 + $0x70] sm:$0xff] }
  0x17   :  { %v2347_v50 = vpack.c.bf16 %v324_v48, %v323_v47  ;;  %v326_v54 = vld [vmem:[%s3481_s6 + $0x78] sm:$0xff]  ;;  %v2314_v55 = vpack.c.bf16 %v216_v52, %v215_v51  ;;  %v217_v57 = vld [vmem:[%s3480_s5 + $0x80] sm:$0xff]  ;;  %v218_v58 = vld [vmem:[%s3480_s5 + $0x88] sm:$0xff] }
  0x18   :  { %2300 = vmatpush1.bf16.msra.mxu1 %v2299_v25  ;;  %v2350_v56 = vpack.c.bf16 %v326_v54, %v325_v53  ;;  %v327_v59 = vld [vmem:[%s3481_s6 + $0x80] sm:$0xff]  ;;  %v328_v60 = vld [vmem:[%s3481_s6 + $0x88] sm:$0xff]  ;;  %v2317_v61 = vpack.c.bf16 %v218_v58, %v217_v57  ;;  %v219_v63 = vld [vmem:[%s3480_s5 + $0x90] sm:$0xff] }
  0x19   :  { %2333 = vmatpush1.bf16.msra.mxu0 %v2332_v20  ;;  %2301 = vmatprep.subr.bf16.mxu1 %v2639_v11  ;;  %v2353_v62 = vpack.c.bf16 %v328_v60, %v327_v59  ;;  %v220_v0 = vld [vmem:[%s3480_s5 + $0x98] sm:$0xff]  ;;  %v329_v1 = vld [vmem:[%s3481_s6 + $0x90] sm:$0xff]  ;;  %v221_v6 = vld [vmem:[%s3480_s5 + $0xa0] sm:$0xff] }
  0x1a   :  { %2334 = vmatprep.subr.bf16.mxu0 %v2639_v11  ;;  %v330_v2 = vld [vmem:[%s3481_s6 + $0x98] sm:$0xff]  ;;  %v2320_v3 = vpack.c.bf16 %v220_v0, %v219_v63  ;;  %v222_v8 = vld [vmem:[%s3480_s5 + $0xa8] sm:$0xff]  ;;  %v331_v9 = vld [vmem:[%s3481_s6 + $0xa0] sm:$0xff] }
  0x1b   :  { %v2356_v4 = vpack.c.bf16 %v330_v2, %v329_v1  ;;  %v332_v10 = vld [vmem:[%s3481_s6 + $0xa8] sm:$0xff]  ;;  %v2323_v12 = vpack.c.bf16 %v222_v8, %v221_v6  ;;  %v223_v14 = vld [vmem:[%s3480_s5 + $0xb0] sm:$0xff]  ;;  %v224_v15 = vld [vmem:[%s3480_s5 + $0xb8] sm:$0xff] }
  0x1c   :  { %2303 = vmatpush1.bf16.msra.mxu1 %v2302_v31  ;;  %v2359_v13 = vpack.c.bf16 %v332_v10, %v331_v9  ;;  %v333_v16 = vld [vmem:[%s3481_s6 + $0xb0] sm:$0xff]  ;;  %v334_v17 = vld [vmem:[%s3481_s6 + $0xb8] sm:$0xff]  ;;  %v2326_v18 = vpack.c.bf16 %v224_v15, %v223_v14  ;;  %v1928_v20 = vld [vmem:[%s3479_s4] ss:$0 sm:$0xff]  ;;  %s2640_s4 = smov 64  }
  0x1d   :  { %2336 = vmatpush1.bf16.msra.mxu0 %v2335_v26  ;;  %2304 = vmatprep.subr.bf16.mxu1 %v2639_v11  ;;  %v2362_v19 = vpack.c.bf16 %v334_v17, %v333_v16  ;;  %v431_v45 = vld [vmem:[%s3484_s9] sm:$0xff]  ;;  %v432_v46 = vld [vmem:[%s3484_s9 + $0x8] sm:$0xff]  ;;  %v433_v48 = vld [vmem:[%s3484_s9 + $0x10] sm:$0xff] }
  0x1e   :  { %2337 = vmatprep.subr.bf16.mxu0 %v2639_v11  ;;  %v2967_v47 = vpack.c.bf16 %v432_v46, %v431_v45  ;;  %v435_v51 = vld [vmem:[%s3484_s9 + $0x20] sm:$0xff]  ;;  %v436_v52 = vld [vmem:[%s3484_s9 + $0x28] sm:$0xff]  ;;  %v437_v54 = vld [vmem:[%s3484_s9 + $0x30] sm:$0xff] }
  0x1f   :  { %v2987_v53 = vpack.c.bf16 %v436_v52, %v435_v51  ;;  %v1934_v57 = vld [vmem:[%s3483_s8] ss:$0 sm:$0xff]  ;;  %vm3085_vm8 = vmpackc.low %vm173_vm1, %vm2643_vm7 }
  0x20   :  { %2306 = vmatpush1.bf16.msra.mxu1 %v2305_v37 }
  0x21   :  { %2339 = vmatpush1.bf16.msra.mxu0 %v2338_v32  ;;  %2307 = vmatprep.subr.bf16.mxu1 %v2639_v11 }
  0x22   :  { %2340 = vmatprep.subr.bf16.mxu0 %v2639_v11 }
  0x24   :  { %2309 = vmatpush1.bf16.msra.mxu1 %v2308_v43 }
  0x25   :  { %2342 = vmatpush1.bf16.msra.mxu0 %v2341_v38  ;;  %2310 = vmatprep.subr.bf16.mxu1 %v2639_v11 }
  0x26   :  { %2343 = vmatprep.subr.bf16.mxu0 %v2639_v11 }
  0x28   :  { %2312 = vmatpush1.bf16.msra.mxu1 %v2311_v49  ;;  %v434_v49 = vld [vmem:[%s3484_s9 + $0x18] sm:$0xff] }
  0x29   :  { %2345 = vmatpush1.bf16.msra.mxu0 %v2344_v44  ;;  %2313 = vmatprep.subr.bf16.mxu1 %v2639_v11 }
  0x2a   :  { %2346 = vmatprep.subr.bf16.mxu0 %v2639_v11 }
  0x2c   :  { %2315 = vmatpush1.bf16.msra.mxu1 %v2314_v55  ;;  %v438_v55 = vld [vmem:[%s3484_s9 + $0x38] sm:$0xff] }
  0x2d   :  { %2348 = vmatpush1.bf16.msra.mxu0 %v2347_v50  ;;  %2316 = vmatprep.subr.bf16.mxu1 %v2639_v11  ;;  %v2977_v50 = vpack.c.bf16 %v434_v49, %v433_v48 }
  0x2e   :  { %2349 = vmatprep.subr.bf16.mxu0 %v2639_v11 }
  0x30   :  { %2318 = vmatpush1.bf16.msra.mxu1 %v2317_v61 }
  0x31   :  { %2351 = vmatpush1.bf16.msra.mxu0 %v2350_v56  ;;  %2319 = vmatprep.subr.bf16.mxu1 %v2639_v11  ;;  %v2997_v56 = vpack.c.bf16 %v438_v55, %v437_v54 }
  0x32   :  { %2352 = vmatprep.subr.bf16.mxu0 %v2639_v11 }
  0x34   :  { %2321 = vmatpush1.bf16.msra.mxu1 %v2320_v3 }
  0x35   :  { %2354 = vmatpush1.bf16.msra.mxu0 %v2353_v62  ;;  %2322 = vmatprep.subr.bf16.mxu1 %v2639_v11 }
  0x36   :  { %2355 = vmatprep.subr.bf16.mxu0 %v2639_v11 }
  0x38   :  { %2324 = vmatpush1.bf16.msra.mxu1 %v2323_v12 }
  0x39   :  { %2357 = vmatpush1.bf16.msra.mxu0 %v2356_v4  ;;  %2325 = vmatprep.subr.bf16.mxu1 %v2639_v11 }
  0x3a   :  { %2358 = vmatprep.subr.bf16.mxu0 %v2639_v11 }
  0x3c   :  { %2327 = vmatpush1.bf16.msra.mxu1 %v2326_v18 }
  0x3d   :  { %2360 = vmatpush1.bf16.msra.mxu0 %v2359_v13  ;;  %2365 = vmatprep.subr.bf16.mxu1 %v2967_v47  ;;  %v1931_v13 = vld [vmem:[%s3482_s7] ss:$0 sm:$0xff] }
  0x3e   :  { %2361 = vmatprep.subr.bf16.mxu0 %v2639_v11 }
  0x41   :  { %2363 = vmatpush1.bf16.msra.mxu0 %v2362_v19 }
  0x42   :  { %2380 = vmatprep.subr.bf16.mxu0 %v2639_v11 }
  0xe7   :  { %v2121_v21 = vpop.f32.mrb[0].mxu0 }
  0xe8   :  { %v2941_v22 = vadd.f32 %v2121_v21, %v1928_v20  ;;  %v146_v23 = vpop.f32.mrb[1].mxu0  ;;  %v156_v21 = vld [vmem:[%s3501_s24 + $0x8] sm:$0xff] }
  0xe9   :  { %v2943_v24 = vadd.f32 %v1928_v20, %v146_v23  ;;  %v155_v20 = vld [vmem:[%s3501_s24] sm:$0xff] }
  0xea   :  { %v170_v25 = vrot.slane %v2941_v22, 6  ;;  %v3022_v23 = vpack.c.bf16 %v156_v21, %v155_v20  ;;  %v855_v20 = vld [vmem:[%s3486_s11 + $0x18] sm:$0xff] }
  0xeb   :  { %v169_v26 = vrot.slane %v2943_v24, 6 }
  0xec   :  { %v175_v30 = vsel %vm173_vm1, 1.0, %v170_v25  ;;  %v183_v36 = vrot.slane %v170_v25, 1  ;;  %v196_v38 = vrot.slane %v170_v25, 2  ;;  %v157_v25 = vld [vmem:[%s3501_s24 + $0x10] sm:$0xff] }
  0xed   :  { %v174_v27 = vsel %vm173_vm1, 1.0, %v169_v26  ;;  %v193_v28 = vrot.slane %v169_v26, 2  ;;  %v180_v29 = vrot.slane %v169_v26, 1  ;;  %v182_v35 = vrot.slane %v175_v30, 1  ;;  %v158_v26 = vld [vmem:[%s3501_s24 + $0x18] sm:$0xff] }
  0xee   :  { %v192_v31 = vrot.slane %v174_v27, 2  ;;  %v179_v32 = vrot.slane %v174_v27, 1  ;;  %v195_v39 = vrot.slane %v175_v30, 2 }
  0xef   :  { %v184_v37 = vsel %vm178_vm3, %v182_v35, %v183_v36 }
  0xf0   :  { %v194_v33 = vsel %vm191_vm2, %v192_v31, %v193_v28  ;;  %v181_v34 = vsel %vm178_vm3, %v179_v32, %v180_v29  ;;  %v197_v42 = vsel %vm191_vm2, %v195_v39, %v196_v38  ;;  %v2642_v28 = vmov 0.0   ;;  %v3043_v29 = vld [vmem:[%s3485_s10] ss:$0 sm:$0xff]  ;;  %v161_v39 = vld [vmem:[%s3501_s24 + $0x30] sm:$0xff] }
  0xf1   :  { %1932 = vmatprep.mubr.msk.f32.mxu1 %vm198_vm4, %v194_v33  ;;  %1935 = vmatprep.mubr.msk.f32.mxu0 %vm198_vm4, %v194_v33  ;;  %v159_v33 = vld [vmem:[%s3501_s24 + $0x20] sm:$0xff] }
  0xf2   :  { %185 = vrot.lane.b32.xlu0 %v181_v34, %s2640_s4  ;;  %v160_v34 = vld [vmem:[%s3501_s24 + $0x28] sm:$0xff] }
  0xf3   :  { %v3053_v36 = vpack.c.bf16 %v160_v34, %v159_v33  ;;  %v1952_v33 = vld [vmem:[%s3480_s5 + $0xc8] sm:$0xff]  ;;  %v1979_v34 = vld [vmem:[%s3481_s6 + $0xc0] sm:$0xff] }
  0xf6   :  { %187 = vrot.lane.b32.xlu0 %v184_v37, %s2640_s4 }
 0x164   :  { %v186_v40 = vpop.permute.xlu0 %185 }
 0x165   :  { %v199_v41 = vsel %vm198_vm4, %v174_v27, %v186_v40  ;;  %v3032_v27 = vpack.c.bf16 %v158_v26, %v157_v25  ;;  %v162_v40 = vld [vmem:[%s3501_s24 + $0x38] sm:$0xff] }
 0x166   :  { %301 = vmatmul.mubr.f32.vlgmr.msra.gmra.mrb[0].mxu1 %v199_v41  ;;  %407 = vmatmul.mubr.f32.vlgmr.msra.gmra.mrb[2].mxu0 %v199_v41  ;;  %v3064_v41 = vpack.c.bf16 %v162_v40, %v161_v39  ;;  %v1954_v39 = vld [vmem:[%s3480_s5 + $0xd8] sm:$0xff] }
 0x167   :  { %1933 = vmatprep.mubr.msk.f32.mxu1 %vm198_vm4, %v197_v42  ;;  %1936 = vmatprep.mubr.msk.f32.mxu0 %vm198_vm4, %v197_v42 }
 0x168   :  { %v188_v43 = vpop.permute.xlu0 %187  ;;  %2367 = vmatpush3.bf16.msra.mxu1 %v2967_v47  ;;  %2382 = vmatpush3.bf16.msra.mxu0 %v3022_v23 }
 0x169   :  { %v200_v44 = vsel %vm198_vm4, %v175_v30, %v188_v43  ;;  %2369 = vmatprep.subr.bf16.mxu1 %v2977_v50  ;;  %2383 = vmatprep.subr.bf16.mxu0 %v2639_v11 }
 0x16a   :  { %306 = vmatmul.mubr.f32.gmra.mrb[2].mxu1 %v200_v44  ;;  %412 = vmatmul.mubr.f32.gmra.mrb[4].mxu0 %v200_v44 }
 0x16b   :  { %2149 = vmatprep.mubr.msk.f32.mxu0 %vm2641_vm5, %v2642_v28 }
 0x16c   :  { %2371 = vmatpush3.bf16.msra.mxu1 %v2977_v50  ;;  %2385 = vmatpush3.bf16.msra.mxu0 %v3032_v27 }
 0x16d   :  { %2373 = vmatprep.subr.bf16.mxu1 %v2987_v53  ;;  %2386 = vmatprep.subr.bf16.mxu0 %v2639_v11 }
 0x170   :  { %2375 = vmatpush3.bf16.msra.mxu1 %v2987_v53 }
 0x171   :  { %2377 = vmatprep.subr.bf16.mxu1 %v2997_v56 }
 0x174   :  { %2379 = vmatpush3.bf16.msra.mxu1 %v2997_v56 }
 0x175   :  { %2392 = vmatprep.subr.bf16.mxu1 %v2639_v11 }
 0x239   :  { %v302_v58 = vpop.f32.mrb[0].mxu1  ;;  %v408_v59 = vpop.f32.mrb[2].mxu0 }
 0x23a   :  { %v409_v60 = vadd.f32 %v1934_v57, %v408_v59  ;;  %v304_v61 = vpop.f32.mrb[1].mxu1  ;;  %v410_v62 = vpop.f32.mrb[3].mxu0  ;;  %v303_v14 = vadd.f32 %v1931_v13, %v302_v58 }
 0x23b   :  { %v163_v62 = vld [vmem:[%s3502_s25] sm:$0xff] }
 0x23c   :  { %v1937_v63 = vmul.f32 -1.442695, %v409_v60 }
 0x23d   :  { %v307_v0 = vpop.f32.mrb[2].mxu1  ;;  %v413_v1 = vpop.f32.mrb[4].mxu0 }
 0x23e   :  { %2557 = vpow2.f32 %v1937_v63  ;;  %v414_v2 = vadd.f32 %v1934_v57, %v413_v1  ;;  %v309_v3 = vpop.f32.mrb[3].mxu1  ;;  %v415_v4 = vpop.f32.mrb[5].mxu0  ;;  %v308_v17 = vadd.f32 %v1931_v13, %v307_v0  ;;  %v164_v63 = vld [vmem:[%s3502_s25 + $0x8] sm:$0x3] }
 0x23f   :  { %v3082_v0 = vpack.c.bf16 %v164_v63, %v163_v62  ;;  %v165_v4 = vld [vmem:[%s3502_s25 + $0x10] sm:$0xff]  ;;  %v1987_v62 = vld [vmem:[%s3481_s6 + $0x100] sm:$0xff]  ;;  %v1988_v63 = vld [vmem:[%s3481_s6 + $0x108] sm:$0xff] }
 0x240   :  { %v1938_v6 = vmul.f32 -1.442695, %v414_v2 }
 0x242   :  { %2559 = vpow2.f32 %v1938_v6  ;;  %v166_v6 = vld [vmem:[%s3502_s25 + $0x18] sm:$0x3] }
 0x248   :  { %v2558_v8 = vpop.eup %2557 }
 0x249   :  { %v423_v9 = vadd.f32 1.0, %v2558_v8 }
 0x24b   :  { %2561 = vrcp.f32 %v423_v9  ;;  %v3099_v9 = vpack.c.bf16 %v166_v6, %v165_v4  ;;  %v1961_v4 = vld [vmem:[%s3480_s5 + $0x110] sm:$0xff]  ;;  %v1962_v6 = vld [vmem:[%s3480_s5 + $0x118] sm:$0xff] }
 0x24c   :  { %v2560_v10 = vpop.eup %2559 }
 0x24d   :  { %v424_v12 = vadd.f32 1.0, %v2560_v10 }
 0x24f   :  { %2563 = vrcp.f32 %v424_v12 }
 0x255   :  { %v2562_v15 = vpop.eup %2561 }
 0x256   :  { %v3008_v16 = vmul.f32 %v2562_v15, %v303_v14  ;;  %v852_v14 = vld [vmem:[%s3486_s11] sm:$0xff]  ;;  %v853_v15 = vld [vmem:[%s3486_s11 + $0x8] sm:$0xff] }
 0x258   :  { %2138 = vmatprep.mubr.msk.f32.mxu1 %vm198_vm4, %v3008_v16 }
 0x259   :  { %v2564_v18 = vpop.eup %2563 }
 0x25a   :  { %v3012_v19 = vmul.f32 %v2564_v18, %v308_v17  ;;  %v3115_v17 = vpack.c.bf16 %v853_v15, %v852_v14  ;;  %v854_v18 = vld [vmem:[%s3486_s11 + $0x10] sm:$0xff]  ;;  %v1963_v14 = vld [vmem:[%s3480_s5 + $0x120] sm:$0xff]  ;;  %v1964_v15 = vld [vmem:[%s3480_s5 + $0x128] sm:$0xff] }
 0x25b   :  { %v3125_v21 = vpack.c.bf16 %v855_v20, %v854_v18  ;;  %v1991_v18 = vld [vmem:[%s3481_s6 + $0x120] sm:$0xff]  ;;  %v1992_v20 = vld [vmem:[%s3481_s6 + $0x128] sm:$0xff] }
 0x25c   :  { %2139 = vmatmul.mubr.msk.f32.vlgmr.msra.gmra.mrb[4].mxu1 %vm198_vm4, %v3012_v19 }
 0x25d   :  { %2167 = vmatprep.mubr.msk.f32.mxu1 %vm2641_vm5, %v2642_v28  ;;  %2395 = vmatpush3.bf16.msk.msra.mxu1 %vm3085_vm8, %v3082_v0 }
 0x25e   :  { %2396 = vmatprep.subr.bf16.mxu1 %v2639_v11 }
 0x32f   :  { %v2140_v30 = vpop.f32.mrb[4].mxu1 }
 0x330   :  { %v518_v31 = vpop.f32.mrb[5].mxu1  ;;  %v524_v37 = vadd.f32 %v2140_v30, %v3043_v29 }
 0x331   :  { %v519_v32 = vadd.f32 %v3043_v29, %v518_v31 }
 0x333   :  { %v527_v35 = vadd.f32 %v519_v32, %v2758_v5  ;;  %v528_v5 = vadd.f32 %v524_v37, %v2765_v7  ;;  %v1951_v32 = vld [vmem:[%s3480_s5 + $0xc0] sm:$0xff]  ;;  %v1980_v37 = vld [vmem:[%s3481_s6 + $0xc8] sm:$0xff] }
 0x334   :  { %v2445_v40 = vpack.c.bf16 %v1980_v37, %v1979_v34  ;;  %v1967_v37 = vld [vmem:[%s3480_s5 + $0x140] sm:$0xff] }
 0x335   :  { %v529_v38 = vmul.f32 0.70710677, %v527_v35  ;;  %v530_v42 = vmul.f32 0.70710677, %v528_v5  ;;  %v2409_v35 = vpack.c.bf16 %v1952_v33, %v1951_v32  ;;  %v1981_v5 = vld [vmem:[%s3481_s6 + $0xd0] sm:$0xff]  ;;  %v1994_v33 = vld [vmem:[%s3481_s6 + $0x138] sm:$0xff] }
 0x336   :  { %v1993_v32 = vld [vmem:[%s3481_s6 + $0x130] sm:$0xff] }
 0x337   :  { %2150 = vmatmul.mubr.msk.f32.vlgmr.msra.gmra.mrb[6].mxu0 %vm73_vm0, %v529_v38  ;;  %v1953_v38 = vld [vmem:[%s3480_s5 + $0xd0] sm:$0xff] }
 0x338   :  { %2388 = vmatpush3.bf16.msra.mxu0 %v3053_v36  ;;  %2160 = vmatprep.mubr.msk.f32.mxu0 %vm2641_vm5, %v2642_v28 }
 0x339   :  { %2389 = vmatprep.subr.bf16.mxu0 %v2639_v11 }
 0x33c   :  { %2391 = vmatpush3.bf16.msra.mxu0 %v3064_v41 }
 0x33d   :  { %2401 = vmatprep.subr.bf16.mxu0 %v3115_v17 }
 0x33f   :  { %2161 = vmatmul.mubr.msk.f32.vlgmr.msra.gmra.mrb[8].mxu0 %vm73_vm0, %v530_v42  ;;  %v1982_v42 = vld [vmem:[%s3481_s6 + $0xd8] sm:$0xff] }
 0x340   :  { %2403 = vmatpush3.bf16.msra.mxu0 %v3115_v17 }
 0x341   :  { %2405 = vmatprep.subr.bf16.mxu0 %v3125_v21 }
 0x344   :  { %2407 = vmatpush3.bf16.msra.mxu0 %v3125_v21 }
 0x345   :  { %2444 = vmatprep.subr.bf16.mxu0 %v2639_v11 }
 0x40a   :  { %v600_v43 = vpop.f32.mrb[6].mxu0 }
 0x40b   :  { %v2151_v44 = vpop.f32.mrb[7].mxu0  ;;  %v678_v45 = vsel %vm677_vm6, %v600_v43, -inf }
 0x40c   :  { %679 = vmax.xlane.f32.xlu1 %v678_v45  ;;  %v2448_v44 = vpack.c.bf16 %v1982_v42, %v1981_v5  ;;  %v1955_v45 = vld [vmem:[%s3480_s5 + $0xe0] sm:$0xff] }
 0x412   :  { %v673_v46 = vpop.f32.mrb[8].mxu0 }
 0x413   :  { %v2162_v48 = vpop.f32.mrb[9].mxu0  ;;  %v681_v49 = vsel %vm677_vm6, %v673_v46, -inf }
 0x414   :  { %682 = vmax.xlane.f32.xlu1 %v681_v49  ;;  %v1983_v48 = vld [vmem:[%s3481_s6 + $0xe0] sm:$0xff]  ;;  %v1984_v49 = vld [vmem:[%s3481_s6 + $0xe8] sm:$0xff] }
 0x499   :  { %v680_v51 = vpop.xlane.xlu1 %679 }
 0x49a   :  { %v684_v7 = vsub.f32 %v600_v43, %v680_v51  ;;  %v2412_v43 = vpack.c.bf16 %v1954_v39, %v1953_v38  ;;  %v1968_v38 = vld [vmem:[%s3480_s5 + $0x148] sm:$0xff]  ;;  %v1995_v39 = vld [vmem:[%s3481_s6 + $0x140] sm:$0xff] }
 0x49b   :  { %v2433_v5 = vpack.c.bf16 %v1968_v38, %v1967_v37 }
 0x49c   :  { %v686_v52 = vmul.f32 1.442695, %v684_v7  ;;  %v2451_v7 = vpack.c.bf16 %v1984_v49, %v1983_v48 }
 0x49e   :  { %2565 = vpow2.f32 %v686_v52  ;;  %v1957_v52 = vld [vmem:[%s3480_s5 + $0xf0] sm:$0xff] }
 0x4a1   :  { %v683_v54 = vpop.xlane.xlu1 %682 }
 0x4a2   :  { %v685_v55 = vsub.f32 %v673_v46, %v683_v54  ;;  %v1956_v46 = vld [vmem:[%s3480_s5 + $0xe8] sm:$0xff]  ;;  %v1958_v54 = vld [vmem:[%s3480_s5 + $0xf8] sm:$0xff] }
 0x4a3   :  { %v2415_v51 = vpack.c.bf16 %v1956_v46, %v1955_v45  ;;  %v1997_v45 = vld [vmem:[%s3481_s6 + $0x150] sm:$0xff]  ;;  %v1998_v46 = vld [vmem:[%s3481_s6 + $0x158] sm:$0xff] }
 0x4a4   :  { %v688_v57 = vmul.f32 1.442695, %v685_v55  ;;  %v1985_v55 = vld [vmem:[%s3481_s6 + $0xf0] sm:$0xff]  ;;  %v2472_v49 = vpack.c.bf16 %v1998_v46, %v1997_v45 }
 0x4a6   :  { %2567 = vpow2.f32 %v688_v57  ;;  %v1986_v57 = vld [vmem:[%s3481_s6 + $0xf8] sm:$0xff] }
 0x4a8   :  { %v2566_v58 = vpop.eup %2565 }
 0x4a9   :  { %v690_v59 = vsel %vm677_vm6, %v2566_v58, 0.0 }
 0x4aa   :  { %691 = vadd.xlane.f32.xlu0 %v690_v59  ;;  %v2454_v59 = vpack.c.bf16 %v1986_v57, %v1985_v55 }
 0x4b0   :  { %v2568_v60 = vpop.eup %2567 }
 0x4b1   :  { %v693_v61 = vsel %vm677_vm6, %v2568_v60, 0.0 }
 0x4b2   :  { %694 = vadd.xlane.f32.xlu1 %v693_v61  ;;  %v1960_v61 = vld [vmem:[%s3480_s5 + $0x108] sm:$0xff] }
 0x537   :  { %v692_v2 = vpop.xlane.xlu0 %691 }
 0x538   :  { %2569 = vrcp.f32 %v692_v2 }
 0x53f   :  { %v695_v3 = vpop.xlane.xlu1 %694 }
 0x540   :  { %2571 = vrcp.f32 %v695_v3  ;;  %v2457_v3 = vpack.c.bf16 %v1988_v63, %v1987_v62 }
 0x542   :  { %v2570_v8 = vpop.eup %2569 }
 0x543   :  { %v698_v10 = vmul.f32 %v2570_v8, %v2566_v58  ;;  %v2418_v58 = vpack.c.bf16 %v1958_v54, %v1957_v52  ;;  %v1989_v8 = vld [vmem:[%s3481_s6 + $0x110] sm:$0xff]  ;;  %v1999_v52 = vld [vmem:[%s3481_s6 + $0x160] sm:$0xff]  ;;  %v2000_v54 = vld [vmem:[%s3481_s6 + $0x168] sm:$0xff] }
 0x544   :  { %v2475_v57 = vpack.c.bf16 %v2000_v54, %v1999_v52 }
 0x545   :  { %2168 = vmatmul.mubr.msk.f32.vlgmr.msra.gmra.mrb[6].mxu1 %vm677_vm6, %v698_v10  ;;  %v1990_v10 = vld [vmem:[%s3481_s6 + $0x118] sm:$0xff] }
 0x546   :  { %2399 = vmatpush3.bf16.msk.msra.mxu1 %vm3085_vm8, %v3099_v9  ;;  %2174 = vmatprep.mubr.msk.f32.mxu1 %vm2641_vm5, %v2642_v28 }
 0x547   :  { %2408 = vmatprep.subr.bf16.mxu1 %v2639_v11 }
 0x54a   :  { %v2572_v12 = vpop.eup %2571 }
 0x54b   :  { %v699_v13 = vmul.f32 %v2572_v12, %v2568_v60  ;;  %v1959_v60 = vld [vmem:[%s3480_s5 + $0x100] sm:$0xff]  ;;  %v2424_v12 = vpack.c.bf16 %v1962_v6, %v1961_v4 }
 0x54c   :  { %v2421_v2 = vpack.c.bf16 %v1960_v61, %v1959_v60  ;;  %v2001_v60 = vld [vmem:[%s3481_s6 + $0x170] sm:$0xff]  ;;  %v2002_v61 = vld [vmem:[%s3481_s6 + $0x178] sm:$0xff] }
 0x54d   :  { %2175 = vmatmul.mubr.msk.f32.vlgmr.msra.gmra.mrb[8].mxu1 %vm677_vm6, %v699_v13  ;;  %v2460_v13 = vpack.c.bf16 %v1990_v10, %v1989_v8  ;;  %v2478_v63 = vpack.c.bf16 %v2002_v61, %v2001_v60  ;;  %v1976_v60 = vld [vmem:[%s3482_s7 + $0x1] ss:$0 sm:$0xff] }
 0x54e   :  { %2410 = vmatpush1.bf16.msra.mxu1 %v2409_v35  ;;  %v2466_v35 = vpack.c.bf16 %v1994_v33, %v1993_v32 }
 0x54f   :  { %2411 = vmatprep.subr.bf16.mxu1 %v2639_v11 }
 0x552   :  { %2413 = vmatpush1.bf16.msra.mxu1 %v2412_v43  ;;  %v1969_v43 = vld [vmem:[%s3480_s5 + $0x150] sm:$0xff] }
 0x553   :  { %2414 = vmatprep.subr.bf16.mxu1 %v2639_v11 }
 0x556   :  { %2416 = vmatpush1.bf16.msra.mxu1 %v2415_v51  ;;  %v1971_v51 = vld [vmem:[%s3480_s5 + $0x160] sm:$0xff] }
 0x557   :  { %2417 = vmatprep.subr.bf16.mxu1 %v2639_v11 }
 0x55a   :  { %2419 = vmatpush1.bf16.msra.mxu1 %v2418_v58  ;;  %v1973_v58 = vld [vmem:[%s3480_s5 + $0x170] sm:$0xff] }
 0x55b   :  { %2420 = vmatprep.subr.bf16.mxu1 %v2639_v11 }
 0x55e   :  { %2422 = vmatpush1.bf16.msra.mxu1 %v2421_v2  ;;  %v3303_v2 = vld [vmem:[%s3487_s12] ss:$0 sm:$0xff] }
 0x55f   :  { %2423 = vmatprep.subr.bf16.mxu1 %v2639_v11 }
 0x562   :  { %2425 = vmatpush1.bf16.msra.mxu1 %v2424_v12 }
 0x563   :  { %2426 = vmatprep.subr.bf16.mxu1 %v2639_v11 }
 0x618   :  { %v772_v25 = vpop.f32.mrb[6].mxu1 }
 0x619   :  { %v2169_v26 = vpop.f32.mrb[7].mxu1  ;;  %2185 = vmatprep.mubr.msk.f32.mxu0 %vm73_vm0, %v772_v25  ;;  %v2427_v25 = vpack.c.bf16 %v1964_v15, %v1963_v14 }
 0x61a   :  { %v2463_v26 = vpack.c.bf16 %v1992_v20, %v1991_v18 }
 0x61b   :  { %2428 = vmatpush1.bf16.msra.mxu1 %v2427_v25 }
 0x61c   :  { %2429 = vmatprep.subr.bf16.mxu1 %v2639_v11 }
 0x620   :  { %v848_v30 = vpop.f32.mrb[8].mxu1 }
 0x621   :  { %v2176_v31 = vpop.f32.mrb[9].mxu1  ;;  %2186 = vmatmul.mubr.msk.f32.vlgmr.msra.gmra.mrb[10].mxu0 %vm73_vm0, %v848_v30  ;;  %v1965_v30 = vld [vmem:[%s3480_s5 + $0x130] sm:$0xff] }
 0x622   :  { %2446 = vmatpush1.bf16.msra.mxu0 %v2445_v40  ;;  %v1966_v31 = vld [vmem:[%s3480_s5 + $0x138] sm:$0xff]  ;;  %v1996_v40 = vld [vmem:[%s3481_s6 + $0x148] sm:$0xff] }
 0x623   :  { %2447 = vmatprep.subr.bf16.mxu0 %v2639_v11  ;;  %v2430_v34 = vpack.c.bf16 %v1966_v31, %v1965_v30  ;;  %v2469_v42 = vpack.c.bf16 %v1996_v40, %v1995_v39 }
 0x625   :  { %2431 = vmatpush1.bf16.msra.mxu1 %v2430_v34 }
 0x626   :  { %2449 = vmatpush1.bf16.msra.mxu0 %v2448_v44  ;;  %2432 = vmatprep.subr.bf16.mxu1 %v2639_v11  ;;  %v1970_v44 = vld [vmem:[%s3480_s5 + $0x158] sm:$0xff] }
 0x627   :  { %2450 = vmatprep.subr.bf16.mxu0 %v2639_v11  ;;  %v2436_v48 = vpack.c.bf16 %v1970_v44, %v1969_v43 }
 0x629   :  { %2434 = vmatpush1.bf16.msra.mxu1 %v2433_v5 }
 0x62a   :  { %2452 = vmatpush1.bf16.msra.mxu0 %v2451_v7  ;;  %2435 = vmatprep.subr.bf16.mxu1 %v2639_v11  ;;  %v1972_v7 = vld [vmem:[%s3480_s5 + $0x168] sm:$0xff] }
 0x62b   :  { %2453 = vmatprep.subr.bf16.mxu0 %v2639_v11  ;;  %v2439_v55 = vpack.c.bf16 %v1972_v7, %v1971_v51 }
 0x62d   :  { %2437 = vmatpush1.bf16.msra.mxu1 %v2436_v48 }
 0x62e   :  { %2455 = vmatpush1.bf16.msra.mxu0 %v2454_v59  ;;  %2438 = vmatprep.subr.bf16.mxu1 %v2639_v11  ;;  %v1974_v59 = vld [vmem:[%s3480_s5 + $0x178] sm:$0xff] }
 0x62f   :  { %2456 = vmatprep.subr.bf16.mxu0 %v2639_v11  ;;  %v2442_v62 = vpack.c.bf16 %v1974_v59, %v1973_v58 }
 0x631   :  { %2440 = vmatpush1.bf16.msra.mxu1 %v2439_v55 }
 0x632   :  { %2458 = vmatpush1.bf16.msra.mxu0 %v2457_v3  ;;  %2441 = vmatprep.subr.bf16.mxu1 %v2639_v11 }
 0x633   :  { %2459 = vmatprep.subr.bf16.mxu0 %v2639_v11 }
 0x635   :  { %2443 = vmatpush1.bf16.msra.mxu1 %v2442_v62 }
 0x636   :  { %2461 = vmatpush1.bf16.msra.mxu0 %v2460_v13  ;;  %2481 = vmatprep.subr.bf16.mxu1 %v2967_v47 }
 0x637   :  { %2462 = vmatprep.subr.bf16.mxu0 %v2639_v11 }
 0x63a   :  { %2464 = vmatpush1.bf16.msra.mxu0 %v2463_v26 }
 0x63b   :  { %2465 = vmatprep.subr.bf16.mxu0 %v2639_v11 }
 0x63e   :  { %2467 = vmatpush1.bf16.msra.mxu0 %v2466_v35 }
 0x63f   :  { %2468 = vmatprep.subr.bf16.mxu0 %v2639_v11 }
 0x642   :  { %2470 = vmatpush1.bf16.msra.mxu0 %v2469_v42 }
 0x643   :  { %2471 = vmatprep.subr.bf16.mxu0 %v2639_v11 }
 0x646   :  { %2473 = vmatpush1.bf16.msra.mxu0 %v2472_v49 }
 0x647   :  { %2474 = vmatprep.subr.bf16.mxu0 %v2639_v11 }
 0x64a   :  { %2476 = vmatpush1.bf16.msra.mxu0 %v2475_v57 }
 0x64b   :  { %2477 = vmatprep.subr.bf16.mxu0 %v2639_v11 }
 0x64e   :  { %2479 = vmatpush1.bf16.msra.mxu0 %v2478_v63 }
 0x64f   :  { %2496 = vmatprep.subr.bf16.mxu0 %v2639_v11 }
 0x6f4   :  { %v2187_v3 = vpop.f32.mrb[10].mxu0 }
 0x6f5   :  { %v941_v4 = vadd.f32 %v2187_v3, %v3303_v2  ;;  %v935_v6 = vpop.f32.mrb[11].mxu0 }
 0x6f6   :  { %v936_v8 = vadd.f32 %v3303_v2, %v935_v6 }
 0x6f7   :  { %v945_v10 = vadd.f32 %v941_v4, %v3012_v19 }
 0x6f8   :  { %v944_v12 = vadd.f32 %v936_v8, %v3008_v16 }
 0x6f9   :  { %v947_v13 = vmul.f32 0.70710677, %v945_v10 }
 0x6fa   :  { %v946_v14 = vmul.f32 0.70710677, %v944_v12 }
 0x6fb   :  { %v949_v15 = vadd.f32 %v947_v13, %v2941_v22  ;;  %v2589_v13 = vld [vmem:[%s3500_s2] sm:$0xff] }
 0x6fc   :  { %v948_v18 = vadd.f32 %v946_v14, %v2943_v24 }
 0x6fd   :  { %v3311_v20 = vmul.f32 0.70710677, %v949_v15 }
 0x6fe   :  { %v3313_v25 = vmul.f32 0.70710677, %v948_v18 }
 0x6ff   :  { %v955_v26 = vrot.slane %v3311_v20, 6 }
 0x700   :  { %v954_v30 = vrot.slane %v3313_v25, 6 }
 0x701   :  { %v959_v34 = vsel %vm173_vm1, 1.0, %v955_v26  ;;  %v966_v37 = vrot.slane %v955_v26, 1  ;;  %v978_v40 = vrot.slane %v955_v26, 2 }
 0x702   :  { %v958_v31 = vsel %vm173_vm1, 1.0, %v954_v30  ;;  %v975_v32 = vrot.slane %v954_v30, 2  ;;  %v963_v19 = vrot.slane %v954_v30, 1  ;;  %v965_v35 = vrot.slane %v959_v34, 1 }
 0x703   :  { %v974_v33 = vrot.slane %v958_v31, 2  ;;  %v962_v16 = vrot.slane %v958_v31, 1  ;;  %v977_v39 = vrot.slane %v959_v34, 2 }
 0x704   :  { %v967_v38 = vsel %vm178_vm3, %v965_v35, %v966_v37 }
 0x705   :  { %v976_v22 = vsel %vm191_vm2, %v974_v33, %v975_v32  ;;  %v964_v24 = vsel %vm178_vm3, %v962_v16, %v963_v19  ;;  %v979_v43 = vsel %vm191_vm2, %v977_v39, %v978_v40 }
 0x706   :  { %1977 = vmatprep.mubr.msk.f32.mxu1 %vm198_vm4, %v976_v22  ;;  %2005 = vmatprep.mubr.msk.f32.mxu0 %vm198_vm4, %v976_v22 }
 0x707   :  { %968 = vrot.lane.b32.xlu1 %v964_v24, %s2640_s4 }
 0x70b   :  { %970 = vrot.lane.b32.xlu1 %v967_v38, %s2640_s4 }
 0x779   :  { %v969_v5 = vpop.permute.xlu1 %968 }
 0x77a   :  { %v980_v42 = vsel %vm198_vm4, %v958_v31, %v969_v5 }
 0x77b   :  { %1084 = vmatmul.mubr.f32.vlgmr.msra.gmra.mrb[10].mxu1 %v980_v42  ;;  %1192 = vmatmul.mubr.f32.vlgmr.msra.gmra.mrb[12].mxu0 %v980_v42 }
 0x77c   :  { %1978 = vmatprep.mubr.msk.f32.mxu1 %vm198_vm4, %v979_v43  ;;  %2006 = vmatprep.mubr.msk.f32.mxu0 %vm198_vm4, %v979_v43 }
 0x77d   :  { %v971_v44 = vpop.permute.xlu1 %970  ;;  %2483 = vmatpush3.bf16.msra.mxu1 %v2967_v47  ;;  %2498 = vmatpush3.bf16.msra.mxu0 %v3022_v23  ;;  %v2004_v47 = vld [vmem:[%s3483_s8 + $0x1] ss:$0 sm:$0xff] }
 0x77e   :  { %v981_v45 = vsel %vm198_vm4, %v959_v34, %v971_v44  ;;  %2485 = vmatprep.subr.bf16.mxu1 %v2977_v50  ;;  %2499 = vmatprep.subr.bf16.mxu0 %v2639_v11  ;;  %v1704_v44 = vld [vmem:[%s3488_s13] sm:$0xff] }
 0x77f   :  { %1089 = vmatmul.mubr.f32.gmra.mrb[12].mxu1 %v981_v45  ;;  %1197 = vmatmul.mubr.f32.gmra.mrb[14].mxu0 %v981_v45  ;;  %v1705_v45 = vld [vmem:[%s3488_s13 + $0x8] sm:$0xff] }
 0x780   :  { %2215 = vmatprep.mubr.msk.f32.mxu0 %vm2641_vm5, %v2642_v28 }
 0x781   :  { %2487 = vmatpush3.bf16.msra.mxu1 %v2977_v50  ;;  %2501 = vmatpush3.bf16.msra.mxu0 %v3032_v27 }
 0x782   :  { %2489 = vmatprep.subr.bf16.mxu1 %v2987_v53  ;;  %2502 = vmatprep.subr.bf16.mxu0 %v2639_v11 }
 0x785   :  { %2491 = vmatpush3.bf16.msra.mxu1 %v2987_v53 }
 0x786   :  { %2493 = vmatprep.subr.bf16.mxu1 %v2997_v56 }
 0x789   :  { %2495 = vmatpush3.bf16.msra.mxu1 %v2997_v56 }
 0x78a   :  { %2508 = vmatprep.subr.bf16.mxu1 %v2639_v11 }
 0x84e   :  { %v1085_v23 = vpop.f32.mrb[10].mxu1  ;;  %v1193_v50 = vpop.f32.mrb[12].mxu0 }
 0x84f   :  { %v1194_v46 = vadd.f32 %v2004_v47, %v1193_v50  ;;  %v1087_v27 = vpop.f32.mrb[11].mxu1  ;;  %v1195_v48 = vpop.f32.mrb[13].mxu0  ;;  %v1086_v61 = vadd.f32 %v1976_v60, %v1085_v23  ;;  %v1706_v50 = vld [vmem:[%s3488_s13 + $0x10] sm:$0xff] }
 0x850   :  { %v1708_v48 = vld [vmem:[%s3488_s13 + $0x20] sm:$0xff] }
 0x851   :  { %v2007_v49 = vmul.f32 -1.442695, %v1194_v46  ;;  %v1707_v46 = vld [vmem:[%s3488_s13 + $0x18] sm:$0xff] }
 0x852   :  { %v1090_v51 = vpop.f32.mrb[12].mxu1  ;;  %v1198_v7 = vpop.f32.mrb[14].mxu0  ;;  %v2528_v27 = vpack.c.bf16 %v1707_v46, %v1706_v50 }
 0x853   :  { %2573 = vpow2.f32 %v2007_v49  ;;  %v1199_v53 = vadd.f32 %v2004_v47, %v1198_v7  ;;  %v1092_v52 = vpop.f32.mrb[13].mxu1  ;;  %v1200_v54 = vpop.f32.mrb[15].mxu0  ;;  %v1091_v3 = vadd.f32 %v1976_v60, %v1090_v51  ;;  %v2524_v47 = vpack.c.bf16 %v1705_v45, %v1704_v44  ;;  %v1709_v49 = vld [vmem:[%s3488_s13 + $0x28] sm:$0xff]  ;;  %v1710_v7 = vld [vmem:[%s3488_s13 + $0x30] sm:$0xff] }
 0x854   :  { %v2532_v51 = vpack.c.bf16 %v1709_v49, %v1708_v48  ;;  %v1800_v54 = vld [vmem:[%s3490_s15] sm:$0xff] }
 0x855   :  { %v2008_v55 = vmul.f32 -1.442695, %v1199_v53  ;;  %v1711_v53 = vld [vmem:[%s3488_s13 + $0x38] sm:$0xff] }
 0x856   :  { %v2536_v52 = vpack.c.bf16 %v1711_v53, %v1710_v7 }
 0x857   :  { %2575 = vpow2.f32 %v2008_v55  ;;  %v1801_v55 = vld [vmem:[%s3490_s15 + $0x8] sm:$0xff] }
 0x85d   :  { %v2574_v56 = vpop.eup %2573 }
 0x85e   :  { %v1208_v57 = vadd.f32 1.0, %v2574_v56  ;;  %v2540_v56 = vpack.c.bf16 %v1801_v55, %v1800_v54 }
 0x860   :  { %2577 = vrcp.f32 %v1208_v57 }
 0x861   :  { %v2576_v58 = vpop.eup %2575 }
 0x862   :  { %v1209_v59 = vadd.f32 1.0, %v2576_v58 }
 0x864   :  { %2579 = vrcp.f32 %v1209_v59 }
 0x86a   :  { %v2578_v62 = vpop.eup %2577 }
 0x86b   :  { %v3351_v63 = vmul.f32 %v2578_v62, %v1086_v61 }
 0x86d   :  { %2204 = vmatprep.mubr.msk.f32.mxu1 %vm198_vm4, %v3351_v63 }
 0x86e   :  { %v2580_v4 = vpop.eup %2579 }
 0x86f   :  { %v3355_v6 = vmul.f32 %v2580_v4, %v1091_v3 }
 0x871   :  { %2205 = vmatmul.mubr.msk.f32.vlgmr.msra.gmra.mrb[14].mxu1 %vm198_vm4, %v3355_v6 }
 0x872   :  { %2511 = vmatpush3.bf16.msk.msra.mxu1 %vm3085_vm8, %v3082_v0  ;;  %2233 = vmatprep.mubr.msk.f32.mxu1 %vm2641_vm5, %v2642_v28  ;;  %v2590_v0 = vld [vmem:[%s3500_s2 + $0x8] sm:$0xff]  ;;  %s2644_s2 = smov [#allocation4]  }
 0x873   :  { %2512 = vmatprep.subr.bf16.mxu1 %v2639_v11  ;;  %s1913_s19 = sshll.u32 %s2644_s2, 4  ;;  %s1914_s19 = int_to_ptr.vmem [resolvable:$true] %s1913_s19 }
 0x874   :  { %s2591_s1 = scalar_lea.vmem %s1914_s19, 256  ;;  %p2596_p1 = scmp.lt.s32.totalorder %s1914_s19, %s1914_s19 }
 0x875   :  { %p2592_p0 = scmp.ne.s32.totalorder %s1914_s19, %s2591_s1  ;;  %p2597_p2 = scmp.lt.s32.totalorder %s2591_s1, %s2591_s1 }
 0x877   :  { %p2598_p3 = por %p2597_p2, %p2596_p1 }
 0x879   :  { %p2599_p4 = pnand %p2598_p3, %p2592_p0 }
 0x944   :  { %v2206_v8 = vpop.f32.mrb[14].mxu1 }
 0x945   :  { %v1288_v10 = vpop.f32.mrb[15].mxu1  ;;  %v1294_v15 = vadd.f32 %v2206_v8, %v3043_v29 }
 0x946   :  { %v1289_v12 = vadd.f32 %v3043_v29, %v1288_v10 }
 0x947   :  { %v1298_v26 = vadd.f32 %v2590_v0, %v1294_v15 }
 0x948   :  { %v1297_v14 = vadd.f32 %v2589_v13, %v1289_v12 }
 0x949   :  { %v1300_v30 = vmul.f32 0.70710677, %v1298_v26 }
 0x94a   :  { %v1299_v18 = vmul.f32 0.70710677, %v1297_v14 }
 0x94c   :  { %2216 = vmatmul.mubr.msk.f32.vlgmr.msra.gmra.mrb[16].mxu0 %vm73_vm0, %v1299_v18 }
 0x94d   :  { %2504 = vmatpush3.bf16.msra.mxu0 %v3053_v36  ;;  %2226 = vmatprep.mubr.msk.f32.mxu0 %vm2641_vm5, %v2642_v28 }
 0x94e   :  { %2505 = vmatprep.subr.bf16.mxu0 %v2639_v11 }
 0x951   :  { %2507 = vmatpush3.bf16.msra.mxu0 %v3064_v41 }
 0x952   :  { %2517 = vmatprep.subr.bf16.mxu0 %v3115_v17 }
 0x954   :  { %2227 = vmatmul.mubr.msk.f32.vlgmr.msra.gmra.mrb[18].mxu0 %vm73_vm0, %v1300_v30 }
 0x955   :  { %2519 = vmatpush3.bf16.msra.mxu0 %v3115_v17 }
 0x956   :  { %2521 = vmatprep.subr.bf16.mxu0 %v3125_v21 }
 0x959   :  { %2523 = vmatpush3.bf16.msra.mxu0 %v3125_v21 }
 0x95a   :  { %2541 = vmatprep.subr.bf16.mxu0 %v2540_v56 }
 0xa1f   :  { %v1370_v29 = vpop.f32.mrb[16].mxu0 }
 0xa20   :  { %v2217_v36 = vpop.f32.mrb[17].mxu0  ;;  %v1447_v31 = vsel %vm677_vm6, %v1370_v29, -inf }
 0xa21   :  { %1448 = vmax.xlane.f32.xlu1 %v1447_v31 }
 0xa27   :  { %v1443_v32 = vpop.f32.mrb[18].mxu0 }
 0xa28   :  { %v2228_v11 = vpop.f32.mrb[19].mxu0  ;;  %v1450_v41 = vsel %vm677_vm6, %v1443_v32, -inf }
 0xa29   :  { %1451 = vmax.xlane.f32.xlu0 %v1450_v41 }
 0xaae   :  { %v1449_v19 = vpop.xlane.xlu1 %1448 }
 0xaaf   :  { %v1453_v33 = vsub.f32 %v1370_v29, %v1449_v19 }
 0xab1   :  { %v1455_v16 = vmul.f32 1.442695, %v1453_v33 }
 0xab3   :  { %2581 = vpow2.f32 %v1455_v16 }
 0xab6   :  { %v1452_v34 = vpop.xlane.xlu0 %1451 }
 0xab7   :  { %v1454_v17 = vsub.f32 %v1443_v32, %v1452_v34 }
 0xab9   :  { %v1457_v22 = vmul.f32 1.442695, %v1454_v17 }
 0xabb   :  { %2583 = vpow2.f32 %v1457_v22 }
 0xabd   :  { %v2582_v24 = vpop.eup %2581 }
 0xabe   :  { %v1459_v21 = vsel %vm677_vm6, %v2582_v24, 0.0 }
 0xabf   :  { %1460 = vadd.xlane.f32.xlu0 %v1459_v21 }
 0xac5   :  { %v2584_v35 = vpop.eup %2583 }
 0xac6   :  { %v1462_v37 = vsel %vm677_vm6, %v2584_v35, 0.0 }
 0xac7   :  { %1463 = vadd.xlane.f32.xlu0 %v1462_v37 }
 0xb4c   :  { %v1461_v38 = vpop.xlane.xlu0 %1460 }
 0xb4d   :  { %2585 = vrcp.f32 %v1461_v38 }
 0xb54   :  { %v1464_v39 = vpop.xlane.xlu0 %1463 }
 0xb55   :  { %2587 = vrcp.f32 %v1464_v39 }
 0xb57   :  { %v2586_v40 = vpop.eup %2585 }
 0xb58   :  { %v1467_v5 = vmul.f32 %v2586_v40, %v2582_v24 }
 0xb5a   :  { %1894 = vst.msk [vmem:[#allocation4] sm:$0xff] %vm677_vm6, %v1467_v5  ;;  %2234 = vmatmul.mubr.msk.f32.vlgmr.msra.gmra.mrb[16].mxu1 %vm677_vm6, %v1467_v5 }
 0xb5b   :  { %2515 = vmatpush3.bf16.msk.msra.mxu1 %vm3085_vm8, %v3099_v9  ;;  %2240 = vmatprep.mubr.msk.f32.mxu1 %vm2641_vm5, %v2642_v28 }
 0xb5c   :  { %2525 = vmatprep.subr.bf16.mxu1 %v2524_v47 }
 0xb5f   :  { %v2588_v42 = vpop.eup %2587 }
 0xb60   :  { %v1468_v43 = vmul.f32 %v2588_v42, %v2584_v35 }
 0xb62   :  { %1895 = vst.msk [vmem:[#allocation4 + $0x8] sm:$0xff] %vm677_vm6, %v1468_v43  ;;  %2241 = vmatmul.mubr.msk.f32.vlgmr.msra.gmra.mrb[18].mxu1 %vm677_vm6, %v1468_v43 }
 0xb63   :  { %2527 = vmatpush3.bf16.msra.mxu1 %v2524_v47 }
 0xb64   :  { %2529 = vmatprep.subr.bf16.mxu1 %v2528_v27 }
 0xb67   :  { %2531 = vmatpush3.bf16.msra.mxu1 %v2528_v27 }
 0xb68   :  { %2533 = vmatprep.subr.bf16.mxu1 %v2532_v51 }
 0xb6b   :  { %2535 = vmatpush3.bf16.msra.mxu1 %v2532_v51 }
 0xb6c   :  { %2537 = vmatprep.subr.bf16.mxu1 %v2536_v52 }
 0xb6f   :  { %2539 = vmatpush3.bf16.msra.mxu1 %v2536_v52 }
 0xc2d   :  { %v1538_v1 = vpop.f32.mrb[16].mxu1 }
 0xc2e   :  { %v2235_v9 = vpop.f32.mrb[17].mxu1  ;;  %2251 = vmatprep.mubr.msk.f32.mxu0 %vm73_vm0, %v1538_v1 }
 0xc35   :  { %v1611_v28 = vpop.f32.mrb[18].mxu1 }
 0xc36   :  { %v2242_v23 = vpop.f32.mrb[19].mxu1  ;;  %2252 = vmatmul.mubr.msk.f32.vlgmr.msra.gmra.mrb[20].mxu0 %vm73_vm0, %v1611_v28 }
 0xc37   :  { %2543 = vmatpush3.bf16.msra.mxu0 %v2540_v56 }
 0xd09   :  { %v2253_v57 = vpop.f32.mrb[20].mxu0 }
 0xd0a   :  { %v1693_v58 = vadd.f32 %v2253_v57, %v3303_v2  ;;  %v1687_v59 = vpop.f32.mrb[21].mxu0 }
 0xd0b   :  { %v1688_v60 = vadd.f32 %v3303_v2, %v1687_v59  ;;  %v1802_v2 = vld [vmem:[%s3490_s15 + $0x10] sm:$0xff] }
 0xd0c   :  { %v1697_v61 = vadd.f32 %v1693_v58, %v3355_v6 }
 0xd0d   :  { %v1696_v62 = vadd.f32 %v1688_v60, %v3351_v63  ;;  %v1803_v63 = vld [vmem:[%s3490_s15 + $0x18] sm:$0xff] }
 0xd0e   :  { %v1699_v3 = vmul.f32 0.70710677, %v1697_v61  ;;  %v2544_v6 = vpack.c.bf16 %v1803_v63, %v1802_v2 }
 0xd0f   :  { %v1698_v4 = vmul.f32 0.70710677, %v1696_v62 }
 0xd10   :  { %v1701_v8 = vadd.f32 %v1699_v3, %v3311_v20  ;;  %2545 = vmatprep.subr.bf16.mxu0 %v2544_v6  ;;  %v2019_v20 = vld [vmem:[%s3489_s14] ss:$0 sm:$0xff] }
 0xd11   :  { %v1700_v10 = vadd.f32 %v1698_v4, %v3313_v25  ;;  %2547 = vmatpush3.bf16.msra.mxu0 %v2544_v6 }
 0xd12   :  { %v1703_v13 = vmul.f32 0.70710677, %v1701_v8 }
 0xd13   :  { %v1702_v12 = vmul.f32 0.70710677, %v1700_v10 }
 0xd15   :  { %2270 = vmatprep.mubr.msk.f32.mxu1 %vm198_vm4, %v1702_v12 }
 0xd16   :  { %2271 = vmatmul.mubr.msk.f32.vlgmr.msra.gmra.mrb[20].mxu1 %vm198_vm4, %v1703_v13 }
 0xde9   :  { %v2272_v25 = vpop.f32.mrb[20].mxu1 }
 0xdea   :  { %v1791_v14 = vpop.f32.mrb[21].mxu1  ;;  %v1797_v18 = vadd.f32 %v2272_v25, %v2019_v20 }
 0xdeb   :  { %v1792_v15 = vadd.f32 %v2019_v20, %v1791_v14 }
 0xded   :  { %2281 = vmatprep.mubr.msk.f32.mxu0 %vm73_vm0, %v1792_v15 }
 0xdee   :  { %2282 = vmatmul.mubr.msk.f32.vlgmr.msra.gmra.mrb[22].mxu0 %vm73_vm0, %v1797_v18 }
 0xdef   :  { %2602 = shalt.err (!%p2599_p4)
}
 0xdf0   :  { %s2603_s20 = scalar_lea.hbm %s3493_s18, 256 }
 0xdf1   :  { %p2604_p5 = scmp.ne.s32.totalorder %s3493_s18, %s2603_s20  ;;  %p2607_p6 = scmp.lt.u32.totalorder %s2603_s20, %s3493_s18 }
 0xdf3   :  { %p2609_p7 = pnand %p2607_p6, %p2604_p5 }
 0xdf5   :  { %2612 = shalt.err (!%p2609_p7)
}
 0xdf6   :  { %s2645_s23 = smov 128   ;;  %s2646_s24 = smov 8   ;;  %v2022_v0 = vld [vmem:[%s3491_s16] ss:$0 sm:$0xff] }
 0xdf7   :  { %1919 = dma.vmem_to_hbm [thread:$0]  %s1914_s19, 256, %s3493_s18, [#allocation5], %s2645_s23, %s2645_s23, %s2646_s24  }
 0xdf8   :  { %s2647_s27 = smov [#allocation2]  }
 0xdf9   :  { %s1901_s5 = sshll.u32 %s2647_s27, 4  ;;  %s1902_s5 = int_to_ptr.vmem [resolvable:$true] %s1901_s5 }
 0xdfa   :  { %s2613_s28 = scalar_lea.vmem %s1902_s5, 256  ;;  %p2618_p9 = scmp.lt.s32.totalorder %s1902_s5, %s1902_s5 }
 0xdfb   :  { %p2614_p8 = scmp.ne.s32.totalorder %s1902_s5, %s2613_s28  ;;  %p2619_p10 = scmp.lt.s32.totalorder %s2613_s28, %s2613_s28 }
 0xdfd   :  { %p2620_p11 = por %p2619_p10, %p2618_p9 }
 0xdff   :  { %p2621_p12 = pnand %p2620_p11, %p2614_p8 }
 0xec1   :  { %v2283_v26 = vpop.f32.mrb[22].mxu0 }
 0xec2   :  { %v1889_v30 = vadd.f32 %v2283_v26, %v2022_v0  ;;  %v1883_v29 = vpop.f32.mrb[23].mxu0 }
 0xec3   :  { %v1884_v36 = vadd.f32 %v2022_v0, %v1883_v29 }
 0xec4   :  { %1893 = vst [vmem:[#allocation2 + $0x8] sm:$0xff] %v1889_v30 }
 0xec5   :  { %1892 = vst [vmem:[#allocation2] sm:$0xff] %v1884_v36 }
 0xec6   :  { %2624 = shalt.err (!%p2621_p12)
}
 0xec7   :  { %s2625_s16 = scalar_lea.hbm %s3492_s17, 256 }
 0xec8   :  { %p2626_p13 = scmp.ne.s32.totalorder %s3492_s17, %s2625_s16  ;;  %p2629_p0 = scmp.lt.u32.totalorder %s2625_s16, %s3492_s17 }
 0xeca   :  { %p2631_p1 = pnand %p2629_p0, %p2626_p13 }
 0xecc   :  { %2634 = shalt.err (!%p2631_p1)
}
 0xecd   :  { %1907 = dma.vmem_to_hbm [thread:$0]  %s1902_s5, 256, %s3492_s17, [#allocation3], %s2645_s23, %s2645_s23, %s2646_s24  }
 0xece   :  { %2635 = dma.done.wait [#allocation3], 256  }
 0xecf   :  { %2636 = vsyncadd [#allocation3], 4294967040 }
 0xed0   :  { %2637 = dma.done.wait [#allocation5], 256  }
 0xed1   :  { %2638 = vsyncadd [#allocation5], 4294967040 }
 0xed2   :  { %1926 = vsyncpa [#allocation3], 1 }
 0xed3   :  { %1927 = vsyncpa [#allocation5], 1 }

</bundles_post_ra>
